<compile_context>
chip_gen: v5e
topology: v5e:2x2
jax: 0.10.0
libtpu: 0.0.40
codegen_flags: <defaults>
</compile_context>

<pallas_src>
import functools
import math

import jax
import jax.numpy as jnp
from jax.experimental import pallas as pl
from jax.experimental.pallas import tpu as pltpu


def encoder_layer_kernel(x_ref, wqkv_ref, bqkv_ref, wo_ref, bo_ref, *rest,
                         nhead, d_model, batch_block, seq_len, fuse_ffn):
    """One grid step: a (B*L, E) token slab through attention + FFN + residuals."""
    o_ref = rest[-1]
    E, B, L = d_model, batch_block, seq_len
    hd = E // nhead

    x = x_ref[...]                                    # (B*L, E) f32
    x_bf = x.astype(jnp.bfloat16)

    # Fused QKV projection for all B*L tokens in one bf16 MXU matmul (f32 accum).
    # The 1/sqrt(hd) attention scale is already folded into the Q weights/bias.
    qkv = jnp.dot(x_bf, wqkv_ref[...], preferred_element_type=jnp.float32)
    qkv = qkv + bqkv_ref[0, :]                        # (B*L, 3E) f32

    q3 = qkv[:, 0:E].reshape(B, L, E)
    k3 = qkv[:, E:2 * E].reshape(B, L, E)
    v3 = qkv[:, 2 * E:3 * E].reshape(B, L, E)

    # Per-head attention; head outputs are concatenated along lanes and fed to a
    # single out_proj matmul with contraction K = E (not nhead folded K = hd ones).
    # TODO(synk): for nhead >> 1, replace the unrolled lane slices with a single
    #             relayout to (B*nhead, L, hd) and one batched einsum.
    # TODO(synk): for large L, switch to KV-blocked online softmax (v7x VMEM).
    heads = []
    for h in range(nhead):
        c0, c1 = h * hd, (h + 1) * hd
        qh = q3[:, :, c0:c1].astype(jnp.bfloat16)     # (B, L, hd)
        kh = k3[:, :, c0:c1].astype(jnp.bfloat16)
        vh = v3[:, :, c0:c1].astype(jnp.bfloat16)

        s = jnp.einsum("bqd,bkd->bqk", qh, kh,
                       preferred_element_type=jnp.float32)            # (B, L, L) f32
        s = s - jnp.max(s, axis=-1, keepdims=True)
        p = jnp.exp(s)
        p = p * pl.reciprocal(jnp.sum(p, axis=-1, keepdims=True), approx=True)
        heads.append(jnp.einsum("bqk,bkd->bqd", p.astype(jnp.bfloat16), vh,
                                preferred_element_type=jnp.float32))   # (B, L, hd)

    o_cat = jnp.concatenate(heads, axis=-1).reshape(B * L, E)          # (B*L, E)
    attn = jnp.dot(o_cat.astype(jnp.bfloat16), wo_ref[...],
                   preferred_element_type=jnp.float32) + bo_ref[0, :]
    src1 = x + attn                                   # residual 1 (f32)

    # FFN.  nn.LeakyReLU(True) => negative_slope == 1.0 => identity: no act op.
    src1_bf = src1.astype(jnp.bfloat16)
    if fuse_ffn:
        wffn_ref, bffn_ref = rest[0], rest[1]         # (E, E) fused in the wrapper
        h2 = jnp.dot(src1_bf, wffn_ref[...],
                     preferred_element_type=jnp.float32) + bffn_ref[0, :]
    else:
        w1_ref, b1_ref, w2_ref, b2_ref = rest[0], rest[1], rest[2], rest[3]
        h1 = jnp.dot(src1_bf, w1_ref[...],
                     preferred_element_type=jnp.float32) + b1_ref[0, :]
        h2 = jnp.dot(h1.astype(jnp.bfloat16), w2_ref[...],
                     preferred_element_type=jnp.float32) + b2_ref[0, :]

    o_ref[...] = (src1 + h2).astype(o_ref.dtype)      # residual 2


_VMEM_SOFT_CAP = 24 * 1024 * 1024   # per-block budget target (fits v7x's 64 MiB w/ headroom)


def _vmem_bytes_estimate(B, L, E, dff, fuse_ffn):
    BL = B * L
    # resident weights (bf16, single-buffered) + f32 biases
    w = (3 * E * E + E * E) * 2 + (3 * E + E) * 4
    w += (E * E * 2 + E * 4) if fuse_ffn else (2 * E * dff * 2 + (dff + E) * 4)
    # double-buffered f32 activation slabs (input + output)
    slabs = 2 * 2 * BL * E * 4
    # live intermediates: qkv (BL,3E), head concat + src1 (BL,E), s/p (B,L,L), h1
    inter = BL * 3 * E * 4 + 2 * BL * E * 4 + 2 * B * L * L * 4
    if not fuse_ffn:
        inter += BL * dff * 4
    return int(1.5 * (w + slabs + inter))


def _pick_batch_block(N, L, E, dff, fuse_ffn, target_rows=512):
    """Pick B | N: prefer >= 2 grid blocks (keeps both v7x TCs busy), token slabs
    of >= target_rows rows when possible, and a VMEM footprint under the cap."""
    divisors = [d for d in range(1, N + 1) if N % d == 0]
    fits = lambda d: _vmem_bytes_estimate(d, L, E, dff, fuse_ffn) <= _VMEM_SOFT_CAP
    for d in divisors:                       # smallest B that reaches target_rows
        if N // d >= 2 and d * L >= target_rows and fits(d):
            return d
    cand = [d for d in divisors if N // d >= 2 and fits(d)]
    if cand:                                 # can't reach target: largest slab that
        return max(cand)                     # still leaves >= 2 grid blocks
    cand = [d for d in divisors if fits(d)]  # N == 1, or nothing fits with 2 blocks
    return max(cand) if cand else 1


def transformer_encoder_layer(src, params, *, nhead):
    """src: (L, N, E) float32  ->  (L, N, E) float32"""
    L, N, E = src.shape
    assert E % nhead == 0
    dff = params["w1"].shape[0]
    hd = E // nhead

    # Fusing the identity-activation FFN into one (E,E) matmul is exact and removes
    # two badly underfilled matmuls whenever dff is small (TranAD default: 16).
    fuse_ffn = dff < 128

    B = _pick_batch_block(N, L, E, dff, fuse_ffn)
    if L % 8 != 0:
        # Sublane tiling / in-kernel (B*L,E)->(B,L,E) reshape wants L % 8 == 0;
        # fall back to one full-array block (always a legal BlockSpec).
        # TODO(synk): pad L to a multiple of 8 and mask padded keys to -inf.
        B = N
    BL = B * L

    # ---- one-time weight prep: transposes, scale folding, FFN fusion, bf16 ----
    scale = 1.0 / math.sqrt(hd)
    wqkv = params["in_w"].T                           # (E, 3E)
    bqkv = params["in_b"].reshape(1, 3 * E)
    wqkv = wqkv.at[:, :E].multiply(scale)             # fold attention scale into Q
    bqkv = bqkv.at[:, :E].multiply(scale)
    wo = params["out_w"].T                            # (E, E)
    bo = params["out_b"].reshape(1, E)

    if fuse_ffn:
        wffn = params["w1"].T @ params["w2"].T        # (E, E); exact: activation is identity
        bffn = (params["b1"] @ params["w2"].T + params["b2"]).reshape(1, E)
        ffn_ops = [wffn.astype(jnp.bfloat16), bffn]
    else:
        ffn_ops = [params["w1"].T.astype(jnp.bfloat16), params["b1"].reshape(1, dff),
                   params["w2"].T.astype(jnp.bfloat16), params["b2"].reshape(1, E)]

    weight_ops = [wqkv.astype(jnp.bfloat16), bqkv,
                  wo.astype(jnp.bfloat16), bo] + ffn_ops

    # Token-major 2D layout: each grid block is a lane-dense (B*L, E) slab.
    # TODO(synk): if the two wrapper transposes show up in profiles, consume the
    #             (L, N, E) array directly with a 3-D BlockSpec and regroup in-kernel.
    x2d = jnp.transpose(src, (1, 0, 2)).reshape(N * L, E)

    kernel = functools.partial(encoder_layer_kernel, nhead=nhead, d_model=E,
                               batch_block=B, seq_len=L, fuse_ffn=fuse_ffn)

    est = _vmem_bytes_estimate(B, L, E, dff, fuse_ffn)
    vmem_limit = int(min(max(2 * est, 32 * 1024 * 1024), 48 * 1024 * 1024))

    def _run(single_buffer_weights):
        def const_spec(shape):
            if single_buffer_weights:
                # Grid-invariant operand: keep one VMEM copy instead of two.
                return pl.BlockSpec(shape, lambda i: (0, 0),
                                    pipeline_mode=pl.Buffered(1))
            return pl.BlockSpec(shape, lambda i: (0, 0))

        return pl.pallas_call(
            kernel,
            out_shape=jax.ShapeDtypeStruct((N * L, E), src.dtype),
            grid_spec=pltpu.PrefetchScalarGridSpec(
                num_scalar_prefetch=0,
                grid=(N // B,),
                in_specs=[pl.BlockSpec((BL, E), lambda i: (i, 0))]
                         + [const_spec(w.shape) for w in weight_ops],
                out_specs=pl.BlockSpec((BL, E), lambda i: (i, 0)),
            ),
            compiler_params=pltpu.CompilerParams(
                dimension_semantics=("parallel",),
                vmem_limit_bytes=vmem_limit),
        )(x2d, *weight_ops)

    try:
        out2d = _run(True)
    except Exception:
        # Some JAX/Mosaic versions reject Buffered(1); double-buffered weights are
        # only a VMEM-footprint regression, never a correctness one.
        out2d = _run(False)

    return out2d.reshape(N, L, E).transpose(1, 0, 2)   # back to (L, N, E)


def reference_layer(src, params, *, nhead):
    """Pure-JAX f32 reference mirroring PyTorch semantics (for validation)."""
    L, N, E = src.shape
    hd = E // nhead
    scale = 1.0 / math.sqrt(hd)
    x = jnp.transpose(src, (1, 0, 2))                  # (N, L, E)

    qkv = jnp.einsum("nle,fe->nlf", x, params["in_w"]) + params["in_b"]
    q, k, v = qkv[..., :E], qkv[..., E:2 * E], qkv[..., 2 * E:]

    def split(t):  # (N, L, E) -> (N, H, L, hd)
        return jnp.transpose(t.reshape(N, L, nhead, hd), (0, 2, 1, 3))

    qh, kh, vh = split(q), split(k), split(v)
    s = jnp.einsum("nhqd,nhkd->nhqk", qh, kh) * scale
    p = jax.nn.softmax(s, axis=-1)
    o = jnp.einsum("nhqk,nhkd->nhqd", p, vh)
    o = jnp.transpose(o, (0, 2, 1, 3)).reshape(N, L, E)
    attn_out = jnp.einsum("nle,fe->nlf", o, params["out_w"]) + params["out_b"]

    src1 = x + attn_out
    h1 = jnp.einsum("nle,fe->nlf", src1, params["w1"]) + params["b1"]
    # LeakyReLU(True) -> negative_slope = 1.0 -> identity
    h2 = jnp.einsum("nlf,ef->nle", h1, params["w2"]) + params["b2"]
    out = src1 + h2
    return jnp.transpose(out, (1, 0, 2))


if __name__ == "__main__":
    L, N, E = 8, 2, 32          # seq_len, batch, d_model
    nhead = 4
    dff = 16                    # dim_feedforward default

    key = jax.random.PRNGKey(0)
    ks = jax.random.split(key, 9)
    params = {
        "in_w":  0.1 * jax.random.normal(ks[0], (3 * E, E), jnp.float32),
        "in_b":  0.1 * jax.random.normal(ks[1], (3 * E,), jnp.float32),
        "out_w": 0.1 * jax.random.normal(ks[2], (E, E), jnp.float32),
        "out_b": 0.1 * jax.random.normal(ks[3], (E,), jnp.float32),
        "w1":    0.1 * jax.random.normal(ks[4], (dff, E), jnp.float32),
        "b1":    0.1 * jax.random.normal(ks[5], (dff,), jnp.float32),
        "w2":    0.1 * jax.random.normal(ks[6], (E, dff), jnp.float32),
        "b2":    0.1 * jax.random.normal(ks[7], (E,), jnp.float32),
    }
    src = jax.random.normal(ks[8], (L, N, E), jnp.float32)

    out = transformer_encoder_layer(src, params, nhead=nhead)
    out = jax.block_until_ready(out)

    ref = reference_layer(src, params, nhead=nhead)
    assert out.shape == (L, N, E)
    # bf16 MXU matmuls (+ approx softmax reciprocal) vs. the f32 reference:
    # expected max abs error ~1e-2 at these magnitudes, so compare loosely.
    assert jnp.allclose(out, ref, atol=3e-2, rtol=3e-2), "mismatch vs reference"

    print("KERNEL_OK")
</pallas_src>

<mosaic_0001>
module attributes {stable_mosaic.version = 11 : i64} {
  func.func @encoder_layer_kernel(%arg0: i32, %arg1: memref<8x32xf32, #tpu.memory_space<vmem>>, %arg2: memref<32x96xbf16, #tpu.memory_space<vmem>>, %arg3: memref<1x96xf32, #tpu.memory_space<vmem>>, %arg4: memref<32x32xbf16, #tpu.memory_space<vmem>>, %arg5: memref<1x32xf32, #tpu.memory_space<vmem>>, %arg6: memref<32x32xbf16, #tpu.memory_space<vmem>>, %arg7: memref<1x32xf32, #tpu.memory_space<vmem>>, %arg8: memref<8x32xf32, #tpu.memory_space<vmem>>) attributes {dimension_semantics = [#tpu.dimension_semantics<parallel>], iteration_bounds = array<i64: 2>, scalar_prefetch = 0 : i64, scratch_operands = 0 : i64, tpu.core_type = #tpu.core_type<tc>, window_params = [{transform_indices = @transform_0, window_bounds = array<i64: 8, 32>}, {pipeline_mode = #tpu.pipeline_mode<synchronous>, transform_indices = @transform_1, window_bounds = array<i64: 32, 96>}, {pipeline_mode = #tpu.pipeline_mode<synchronous>, transform_indices = @transform_2, window_bounds = array<i64: 1, 96>}, {pipeline_mode = #tpu.pipeline_mode<synchronous>, transform_indices = @transform_3, window_bounds = array<i64: 32, 32>}, {pipeline_mode = #tpu.pipeline_mode<synchronous>, transform_indices = @transform_4, window_bounds = array<i64: 1, 32>}, {pipeline_mode = #tpu.pipeline_mode<synchronous>, transform_indices = @transform_5, window_bounds = array<i64: 32, 32>}, {pipeline_mode = #tpu.pipeline_mode<synchronous>, transform_indices = @transform_6, window_bounds = array<i64: 1, 32>}, {transform_indices = @transform_7, window_bounds = array<i64: 8, 32>}]} {
    %c0 = arith.constant 0 : index
    %c0_0 = arith.constant 0 : index
    %0 = vector.load %arg1[%c0, %c0_0] : memref<8x32xf32, #tpu.memory_space<vmem>>, vector<8x32xf32>
    %1 = arith.truncf %0 : vector<8x32xf32> to vector<8x32xbf16>
    %c0_1 = arith.constant 0 : index
    %c0_2 = arith.constant 0 : index
    %2 = vector.load %arg2[%c0_1, %c0_2] : memref<32x96xbf16, #tpu.memory_space<vmem>>, vector<32x96xbf16>
    %cst = arith.constant dense<0.000000e+00> : vector<8x96xf32>
    %3 = tpu.matmul %1, %2, %cst {dimension_numbers = #tpu.dot_dimension_numbers<[1], [0], [0], [1], [0, 0, 1, 1], [], []>} : vector<8x32xbf16>, vector<32x96xbf16>, vector<8x96xf32> -> vector<8x96xf32>
    %c0_3 = arith.constant 0 : index
    %c0_4 = arith.constant 0 : index
    %4 = vector.load %arg3[%c0_3, %c0_4] : memref<1x96xf32, #tpu.memory_space<vmem>>, vector<1x96xf32>
    %5 = vector.shape_cast %4 : vector<1x96xf32> to vector<96xf32>
    %6 = vector.shape_cast %5 : vector<96xf32> to vector<1x96xf32>
    %7 = vector.broadcast %6 : vector<1x96xf32> to vector<8x96xf32>
    %8 = arith.addf %3, %7 : vector<8x96xf32>
    %9 = vector.extract_strided_slice %8 {offsets = [0, 0], sizes = [8, 32], strides = [1, 1]} : vector<8x96xf32> to vector<8x32xf32>
    %10 = vector.shape_cast %9 : vector<8x32xf32> to vector<1x8x32xf32>
    %11 = vector.extract_strided_slice %8 {offsets = [0, 32], sizes = [8, 32], strides = [1, 1]} : vector<8x96xf32> to vector<8x32xf32>
    %12 = vector.shape_cast %11 : vector<8x32xf32> to vector<1x8x32xf32>
    %13 = vector.extract_strided_slice %8 {offsets = [0, 64], sizes = [8, 32], strides = [1, 1]} : vector<8x96xf32> to vector<8x32xf32>
    %14 = vector.shape_cast %13 : vector<8x32xf32> to vector<1x8x32xf32>
    %15 = vector.extract_strided_slice %10 {offsets = [0, 0, 0], sizes = [1, 8, 8], strides = [1, 1, 1]} : vector<1x8x32xf32> to vector<1x8x8xf32>
    %16 = arith.truncf %15 : vector<1x8x8xf32> to vector<1x8x8xbf16>
    %17 = vector.extract_strided_slice %12 {offsets = [0, 0, 0], sizes = [1, 8, 8], strides = [1, 1, 1]} : vector<1x8x32xf32> to vector<1x8x8xf32>
    %18 = arith.truncf %17 : vector<1x8x8xf32> to vector<1x8x8xbf16>
    %19 = vector.extract_strided_slice %14 {offsets = [0, 0, 0], sizes = [1, 8, 8], strides = [1, 1, 1]} : vector<1x8x32xf32> to vector<1x8x8xf32>
    %20 = arith.truncf %19 : vector<1x8x8xf32> to vector<1x8x8xbf16>
    "tpu.trace_start"() <{level = 10 : i32, message = "bqd,bkd->bqk"}> : () -> ()
    %cst_5 = arith.constant dense<0.000000e+00> : vector<1x8x8xf32>
    %21 = tpu.matmul %16, %18, %cst_5 {dimension_numbers = #tpu.dot_dimension_numbers<[2], [2], [1], [1], [0, 0, 0, 1, 1, 1], [0], [0]>} : vector<1x8x8xbf16>, vector<1x8x8xbf16>, vector<1x8x8xf32> -> vector<1x8x8xf32>
    "tpu.trace_stop"() : () -> ()
    %cst_6 = arith.constant dense<0xFF800000> : vector<1x8xf32>
    %22 = vector.multi_reduction <maximumf>, %21, %cst_6 [2] : vector<1x8x8xf32> to vector<1x8xf32>
    %23 = vector.shape_cast %22 : vector<1x8xf32> to vector<1x8x1xf32>
    %24 = vector.broadcast %23 : vector<1x8x1xf32> to vector<1x8x8xf32>
    %25 = arith.subf %21, %24 : vector<1x8x8xf32>
    %26 = math.exp %25 : vector<1x8x8xf32>
    %cst_7 = arith.constant dense<0.000000e+00> : vector<1x8xf32>
    %27 = vector.multi_reduction <add>, %26, %cst_7 [2] : vector<1x8x8xf32> to vector<1x8xf32>
    %28 = vector.shape_cast %27 : vector<1x8xf32> to vector<1x8x1xf32>
    %29 = tpu.reciprocal %28 {approx = true} : vector<1x8x1xf32> -> vector<1x8x1xf32>
    %30 = vector.broadcast %29 : vector<1x8x1xf32> to vector<1x8x8xf32>
    %31 = arith.mulf %26, %30 : vector<1x8x8xf32>
    %32 = arith.truncf %31 : vector<1x8x8xf32> to vector<1x8x8xbf16>
    "tpu.trace_start"() <{level = 10 : i32, message = "bqk,bkd->bqd"}> : () -> ()
    %cst_8 = arith.constant dense<0.000000e+00> : vector<1x8x8xf32>
    %33 = tpu.matmul %32, %20, %cst_8 {dimension_numbers = #tpu.dot_dimension_numbers<[2], [1], [1], [2], [0, 0, 0, 1, 1, 2], [0], [0]>} : vector<1x8x8xbf16>, vector<1x8x8xbf16>, vector<1x8x8xf32> -> vector<1x8x8xf32>
    "tpu.trace_stop"() : () -> ()
    %34 = vector.extract_strided_slice %10 {offsets = [0, 0, 8], sizes = [1, 8, 8], strides = [1, 1, 1]} : vector<1x8x32xf32> to vector<1x8x8xf32>
    %35 = arith.truncf %34 : vector<1x8x8xf32> to vector<1x8x8xbf16>
    %36 = vector.extract_strided_slice %12 {offsets = [0, 0, 8], sizes = [1, 8, 8], strides = [1, 1, 1]} : vector<1x8x32xf32> to vector<1x8x8xf32>
    %37 = arith.truncf %36 : vector<1x8x8xf32> to vector<1x8x8xbf16>
    %38 = vector.extract_strided_slice %14 {offsets = [0, 0, 8], sizes = [1, 8, 8], strides = [1, 1, 1]} : vector<1x8x32xf32> to vector<1x8x8xf32>
    %39 = arith.truncf %38 : vector<1x8x8xf32> to vector<1x8x8xbf16>
    "tpu.trace_start"() <{level = 10 : i32, message = "bqd,bkd->bqk"}> : () -> ()
    %cst_9 = arith.constant dense<0.000000e+00> : vector<1x8x8xf32>
    %40 = tpu.matmul %35, %37, %cst_9 {dimension_numbers = #tpu.dot_dimension_numbers<[2], [2], [1], [1], [0, 0, 0, 1, 1, 1], [0], [0]>} : vector<1x8x8xbf16>, vector<1x8x8xbf16>, vector<1x8x8xf32> -> vector<1x8x8xf32>
    "tpu.trace_stop"() : () -> ()
    %cst_10 = arith.constant dense<0xFF800000> : vector<1x8xf32>
    %41 = vector.multi_reduction <maximumf>, %40, %cst_10 [2] : vector<1x8x8xf32> to vector<1x8xf32>
    %42 = vector.shape_cast %41 : vector<1x8xf32> to vector<1x8x1xf32>
    %43 = vector.broadcast %42 : vector<1x8x1xf32> to vector<1x8x8xf32>
    %44 = arith.subf %40, %43 : vector<1x8x8xf32>
    %45 = math.exp %44 : vector<1x8x8xf32>
    %cst_11 = arith.constant dense<0.000000e+00> : vector<1x8xf32>
    %46 = vector.multi_reduction <add>, %45, %cst_11 [2] : vector<1x8x8xf32> to vector<1x8xf32>
    %47 = vector.shape_cast %46 : vector<1x8xf32> to vector<1x8x1xf32>
    %48 = tpu.reciprocal %47 {approx = true} : vector<1x8x1xf32> -> vector<1x8x1xf32>
    %49 = vector.broadcast %48 : vector<1x8x1xf32> to vector<1x8x8xf32>
    %50 = arith.mulf %45, %49 : vector<1x8x8xf32>
    %51 = arith.truncf %50 : vector<1x8x8xf32> to vector<1x8x8xbf16>
    "tpu.trace_start"() <{level = 10 : i32, message = "bqk,bkd->bqd"}> : () -> ()
    %cst_12 = arith.constant dense<0.000000e+00> : vector<1x8x8xf32>
    %52 = tpu.matmul %51, %39, %cst_12 {dimension_numbers = #tpu.dot_dimension_numbers<[2], [1], [1], [2], [0, 0, 0, 1, 1, 2], [0], [0]>} : vector<1x8x8xbf16>, vector<1x8x8xbf16>, vector<1x8x8xf32> -> vector<1x8x8xf32>
    "tpu.trace_stop"() : () -> ()
    %53 = vector.extract_strided_slice %10 {offsets = [0, 0, 16], sizes = [1, 8, 8], strides = [1, 1, 1]} : vector<1x8x32xf32> to vector<1x8x8xf32>
    %54 = arith.truncf %53 : vector<1x8x8xf32> to vector<1x8x8xbf16>
    %55 = vector.extract_strided_slice %12 {offsets = [0, 0, 16], sizes = [1, 8, 8], strides = [1, 1, 1]} : vector<1x8x32xf32> to vector<1x8x8xf32>
    %56 = arith.truncf %55 : vector<1x8x8xf32> to vector<1x8x8xbf16>
    %57 = vector.extract_strided_slice %14 {offsets = [0, 0, 16], sizes = [1, 8, 8], strides = [1, 1, 1]} : vector<1x8x32xf32> to vector<1x8x8xf32>
    %58 = arith.truncf %57 : vector<1x8x8xf32> to vector<1x8x8xbf16>
    "tpu.trace_start"() <{level = 10 : i32, message = "bqd,bkd->bqk"}> : () -> ()
    %cst_13 = arith.constant dense<0.000000e+00> : vector<1x8x8xf32>
    %59 = tpu.matmul %54, %56, %cst_13 {dimension_numbers = #tpu.dot_dimension_numbers<[2], [2], [1], [1], [0, 0, 0, 1, 1, 1], [0], [0]>} : vector<1x8x8xbf16>, vector<1x8x8xbf16>, vector<1x8x8xf32> -> vector<1x8x8xf32>
    "tpu.trace_stop"() : () -> ()
    %cst_14 = arith.constant dense<0xFF800000> : vector<1x8xf32>
    %60 = vector.multi_reduction <maximumf>, %59, %cst_14 [2] : vector<1x8x8xf32> to vector<1x8xf32>
    %61 = vector.shape_cast %60 : vector<1x8xf32> to vector<1x8x1xf32>
    %62 = vector.broadcast %61 : vector<1x8x1xf32> to vector<1x8x8xf32>
    %63 = arith.subf %59, %62 : vector<1x8x8xf32>
    %64 = math.exp %63 : vector<1x8x8xf32>
    %cst_15 = arith.constant dense<0.000000e+00> : vector<1x8xf32>
    %65 = vector.multi_reduction <add>, %64, %cst_15 [2] : vector<1x8x8xf32> to vector<1x8xf32>
    %66 = vector.shape_cast %65 : vector<1x8xf32> to vector<1x8x1xf32>
    %67 = tpu.reciprocal %66 {approx = true} : vector<1x8x1xf32> -> vector<1x8x1xf32>
    %68 = vector.broadcast %67 : vector<1x8x1xf32> to vector<1x8x8xf32>
    %69 = arith.mulf %64, %68 : vector<1x8x8xf32>
    %70 = arith.truncf %69 : vector<1x8x8xf32> to vector<1x8x8xbf16>
    "tpu.trace_start"() <{level = 10 : i32, message = "bqk,bkd->bqd"}> : () -> ()
    %cst_16 = arith.constant dense<0.000000e+00> : vector<1x8x8xf32>
    %71 = tpu.matmul %70, %58, %cst_16 {dimension_numbers = #tpu.dot_dimension_numbers<[2], [1], [1], [2], [0, 0, 0, 1, 1, 2], [0], [0]>} : vector<1x8x8xbf16>, vector<1x8x8xbf16>, vector<1x8x8xf32> -> vector<1x8x8xf32>
    "tpu.trace_stop"() : () -> ()
    %72 = vector.extract_strided_slice %10 {offsets = [0, 0, 24], sizes = [1, 8, 8], strides = [1, 1, 1]} : vector<1x8x32xf32> to vector<1x8x8xf32>
    %73 = arith.truncf %72 : vector<1x8x8xf32> to vector<1x8x8xbf16>
    %74 = vector.extract_strided_slice %12 {offsets = [0, 0, 24], sizes = [1, 8, 8], strides = [1, 1, 1]} : vector<1x8x32xf32> to vector<1x8x8xf32>
    %75 = arith.truncf %74 : vector<1x8x8xf32> to vector<1x8x8xbf16>
    %76 = vector.extract_strided_slice %14 {offsets = [0, 0, 24], sizes = [1, 8, 8], strides = [1, 1, 1]} : vector<1x8x32xf32> to vector<1x8x8xf32>
    %77 = arith.truncf %76 : vector<1x8x8xf32> to vector<1x8x8xbf16>
    "tpu.trace_start"() <{level = 10 : i32, message = "bqd,bkd->bqk"}> : () -> ()
    %cst_17 = arith.constant dense<0.000000e+00> : vector<1x8x8xf32>
    %78 = tpu.matmul %73, %75, %cst_17 {dimension_numbers = #tpu.dot_dimension_numbers<[2], [2], [1], [1], [0, 0, 0, 1, 1, 1], [0], [0]>} : vector<1x8x8xbf16>, vector<1x8x8xbf16>, vector<1x8x8xf32> -> vector<1x8x8xf32>
    "tpu.trace_stop"() : () -> ()
    %cst_18 = arith.constant dense<0xFF800000> : vector<1x8xf32>
    %79 = vector.multi_reduction <maximumf>, %78, %cst_18 [2] : vector<1x8x8xf32> to vector<1x8xf32>
    %80 = vector.shape_cast %79 : vector<1x8xf32> to vector<1x8x1xf32>
    %81 = vector.broadcast %80 : vector<1x8x1xf32> to vector<1x8x8xf32>
    %82 = arith.subf %78, %81 : vector<1x8x8xf32>
    %83 = math.exp %82 : vector<1x8x8xf32>
    %cst_19 = arith.constant dense<0.000000e+00> : vector<1x8xf32>
    %84 = vector.multi_reduction <add>, %83, %cst_19 [2] : vector<1x8x8xf32> to vector<1x8xf32>
    %85 = vector.shape_cast %84 : vector<1x8xf32> to vector<1x8x1xf32>
    %86 = tpu.reciprocal %85 {approx = true} : vector<1x8x1xf32> -> vector<1x8x1xf32>
    %87 = vector.broadcast %86 : vector<1x8x1xf32> to vector<1x8x8xf32>
    %88 = arith.mulf %83, %87 : vector<1x8x8xf32>
    %89 = arith.truncf %88 : vector<1x8x8xf32> to vector<1x8x8xbf16>
    "tpu.trace_start"() <{level = 10 : i32, message = "bqk,bkd->bqd"}> : () -> ()
    %cst_20 = arith.constant dense<0.000000e+00> : vector<1x8x8xf32>
    %90 = tpu.matmul %89, %77, %cst_20 {dimension_numbers = #tpu.dot_dimension_numbers<[2], [1], [1], [2], [0, 0, 0, 1, 1, 2], [0], [0]>} : vector<1x8x8xbf16>, vector<1x8x8xbf16>, vector<1x8x8xf32> -> vector<1x8x8xf32>
    "tpu.trace_stop"() : () -> ()
    %91 = tpu.concatenate %33, %52, %71, %90 in 2 : vector<1x8x8xf32>, vector<1x8x8xf32>, vector<1x8x8xf32>, vector<1x8x8xf32> -> vector<1x8x32xf32>
    %92 = vector.shape_cast %91 : vector<1x8x32xf32> to vector<8x32xf32>
    %93 = arith.truncf %92 : vector<8x32xf32> to vector<8x32xbf16>
    %c0_21 = arith.constant 0 : index
    %c0_22 = arith.constant 0 : index
    %94 = vector.load %arg4[%c0_21, %c0_22] : memref<32x32xbf16, #tpu.memory_space<vmem>>, vector<32x32xbf16>
    %cst_23 = arith.constant dense<0.000000e+00> : vector<8x32xf32>
    %95 = tpu.matmul %93, %94, %cst_23 {dimension_numbers = #tpu.dot_dimension_numbers<[1], [0], [0], [1], [0, 0, 1, 1], [], []>} : vector<8x32xbf16>, vector<32x32xbf16>, vector<8x32xf32> -> vector<8x32xf32>
    %c0_24 = arith.constant 0 : index
    %c0_25 = arith.constant 0 : index
    %96 = vector.load %arg5[%c0_24, %c0_25] : memref<1x32xf32, #tpu.memory_space<vmem>>, vector<1x32xf32>
    %97 = vector.shape_cast %96 : vector<1x32xf32> to vector<32xf32>
    %98 = vector.shape_cast %97 : vector<32xf32> to vector<1x32xf32>
    %99 = vector.broadcast %98 : vector<1x32xf32> to vector<8x32xf32>
    %100 = arith.addf %95, %99 : vector<8x32xf32>
    %101 = arith.addf %0, %100 : vector<8x32xf32>
    %102 = arith.truncf %101 : vector<8x32xf32> to vector<8x32xbf16>
    %c0_26 = arith.constant 0 : index
    %c0_27 = arith.constant 0 : index
    %103 = vector.load %arg6[%c0_26, %c0_27] : memref<32x32xbf16, #tpu.memory_space<vmem>>, vector<32x32xbf16>
    %cst_28 = arith.constant dense<0.000000e+00> : vector<8x32xf32>
    %104 = tpu.matmul %102, %103, %cst_28 {dimension_numbers = #tpu.dot_dimension_numbers<[1], [0], [0], [1], [0, 0, 1, 1], [], []>} : vector<8x32xbf16>, vector<32x32xbf16>, vector<8x32xf32> -> vector<8x32xf32>
    %c0_29 = arith.constant 0 : index
    %c0_30 = arith.constant 0 : index
    %105 = vector.load %arg7[%c0_29, %c0_30] : memref<1x32xf32, #tpu.memory_space<vmem>>, vector<1x32xf32>
    %106 = vector.shape_cast %105 : vector<1x32xf32> to vector<32xf32>
    %107 = vector.shape_cast %106 : vector<32xf32> to vector<1x32xf32>
    %108 = vector.broadcast %107 : vector<1x32xf32> to vector<8x32xf32>
    %109 = arith.addf %104, %108 : vector<8x32xf32>
    %110 = arith.addf %101, %109 : vector<8x32xf32>
    %c0_31 = arith.constant 0 : index
    %c0_32 = arith.constant 0 : index
    %111 = vector.load %arg8[%c0_31, %c0_32] : memref<8x32xf32, #tpu.memory_space<vmem>>, vector<8x32xf32>
    tpu.vector_store %arg8[%c0_31, %c0_32], %110 {strides = array<i32>} : memref<8x32xf32, #tpu.memory_space<vmem>>, vector<8x32xf32>,
    return
  }
  func.func @transform_0(%arg0: i32) -> (i32, i32) {
    %c0_i32 = arith.constant 0 : i32
    %c0_i32_0 = arith.constant 0 : i32
    return %arg0, %c0_i32 : i32, i32
  }
  func.func @transform_1(%arg0: i32) -> (i32, i32) {
    %c0_i32 = arith.constant 0 : i32
    %c0_i32_0 = arith.constant 0 : i32
    %c0_i32_1 = arith.constant 0 : i32
    return %c0_i32, %c0_i32_0 : i32, i32
  }
  func.func @transform_2(%arg0: i32) -> (i32, i32) {
    %c0_i32 = arith.constant 0 : i32
    %c0_i32_0 = arith.constant 0 : i32
    %c0_i32_1 = arith.constant 0 : i32
    return %c0_i32, %c0_i32_0 : i32, i32
  }
  func.func @transform_3(%arg0: i32) -> (i32, i32) {
    %c0_i32 = arith.constant 0 : i32
    %c0_i32_0 = arith.constant 0 : i32
    %c0_i32_1 = arith.constant 0 : i32
    return %c0_i32, %c0_i32_0 : i32, i32
  }
  func.func @transform_4(%arg0: i32) -> (i32, i32) {
    %c0_i32 = arith.constant 0 : i32
    %c0_i32_0 = arith.constant 0 : i32
    %c0_i32_1 = arith.constant 0 : i32
    return %c0_i32, %c0_i32_0 : i32, i32
  }
  func.func @transform_5(%arg0: i32) -> (i32, i32) {
    %c0_i32 = arith.constant 0 : i32
    %c0_i32_0 = arith.constant 0 : i32
    %c0_i32_1 = arith.constant 0 : i32
    return %c0_i32, %c0_i32_0 : i32, i32
  }
  func.func @transform_6(%arg0: i32) -> (i32, i32) {
    %c0_i32 = arith.constant 0 : i32
    %c0_i32_0 = arith.constant 0 : i32
    %c0_i32_1 = arith.constant 0 : i32
    return %c0_i32, %c0_i32_0 : i32, i32
  }
  func.func @transform_7(%arg0: i32) -> (i32, i32) {
    %c0_i32 = arith.constant 0 : i32
    %c0_i32_0 = arith.constant 0 : i32
    return %arg0, %c0_i32 : i32, i32
  }
}

module attributes {stable_mosaic.version = 11 : i64} {
  func.func @encoder_layer_kernel(%arg0: i32, %arg1: memref<8x32xf32, #tpu.memory_space<vmem>>, %arg2: memref<32x96xbf16, #tpu.memory_space<vmem>>, %arg3: memref<1x96xf32, #tpu.memory_space<vmem>>, %arg4: memref<32x32xbf16, #tpu.memory_space<vmem>>, %arg5: memref<1x32xf32, #tpu.memory_space<vmem>>, %arg6: memref<32x32xbf16, #tpu.memory_space<vmem>>, %arg7: memref<1x32xf32, #tpu.memory_space<vmem>>, %arg8: memref<8x32xf32, #tpu.memory_space<vmem>>) attributes {dimension_semantics = [#tpu.dimension_semantics<parallel>], iteration_bounds = array<i64: 2>, scalar_prefetch = 0 : i64, scratch_operands = 0 : i64, tpu.core_type = #tpu.core_type<tc>, window_params = [{transform_indices = @transform_0, window_bounds = array<i64: 8, 32>}, {pipeline_mode = #tpu.pipeline_mode<synchronous>, transform_indices = @transform_1, window_bounds = array<i64: 32, 96>}, {pipeline_mode = #tpu.pipeline_mode<synchronous>, transform_indices = @transform_2, window_bounds = array<i64: 1, 96>}, {pipeline_mode = #tpu.pipeline_mode<synchronous>, transform_indices = @transform_3, window_bounds = array<i64: 32, 32>}, {pipeline_mode = #tpu.pipeline_mode<synchronous>, transform_indices = @transform_4, window_bounds = array<i64: 1, 32>}, {pipeline_mode = #tpu.pipeline_mode<synchronous>, transform_indices = @transform_5, window_bounds = array<i64: 32, 32>}, {pipeline_mode = #tpu.pipeline_mode<synchronous>, transform_indices = @transform_6, window_bounds = array<i64: 1, 32>}, {transform_indices = @transform_7, window_bounds = array<i64: 8, 32>}]} {
    %c0 = arith.constant 0 : index
    %c0_0 = arith.constant 0 : index
    %0 = vector.load %arg1[%c0, %c0_0] : memref<8x32xf32, #tpu.memory_space<vmem>>, vector<8x32xf32>
    %1 = arith.truncf %0 : vector<8x32xf32> to vector<8x32xbf16>
    %c0_1 = arith.constant 0 : index
    %c0_2 = arith.constant 0 : index
    %2 = vector.load %arg2[%c0_1, %c0_2] : memref<32x96xbf16, #tpu.memory_space<vmem>>, vector<32x96xbf16>
    %cst = arith.constant dense<0.000000e+00> : vector<8x96xf32>
    %3 = tpu.matmul %1, %2, %cst {dimension_numbers = #tpu.dot_dimension_numbers<[1], [0], [0], [1], [0, 0, 1, 1], [], []>} : vector<8x32xbf16>, vector<32x96xbf16>, vector<8x96xf32> -> vector<8x96xf32>
    %c0_3 = arith.constant 0 : index
    %c0_4 = arith.constant 0 : index
    %4 = vector.load %arg3[%c0_3, %c0_4] : memref<1x96xf32, #tpu.memory_space<vmem>>, vector<1x96xf32>
    %5 = vector.shape_cast %4 : vector<1x96xf32> to vector<96xf32>
    %6 = vector.shape_cast %5 : vector<96xf32> to vector<1x96xf32>
    %7 = vector.broadcast %6 : vector<1x96xf32> to vector<8x96xf32>
    %8 = arith.addf %3, %7 : vector<8x96xf32>
    %9 = vector.extract_strided_slice %8 {offsets = [0, 0], sizes = [8, 32], strides = [1, 1]} : vector<8x96xf32> to vector<8x32xf32>
    %10 = vector.shape_cast %9 : vector<8x32xf32> to vector<1x8x32xf32>
    %11 = vector.extract_strided_slice %8 {offsets = [0, 32], sizes = [8, 32], strides = [1, 1]} : vector<8x96xf32> to vector<8x32xf32>
    %12 = vector.shape_cast %11 : vector<8x32xf32> to vector<1x8x32xf32>
    %13 = vector.extract_strided_slice %8 {offsets = [0, 64], sizes = [8, 32], strides = [1, 1]} : vector<8x96xf32> to vector<8x32xf32>
    %14 = vector.shape_cast %13 : vector<8x32xf32> to vector<1x8x32xf32>
    %15 = vector.extract_strided_slice %10 {offsets = [0, 0, 0], sizes = [1, 8, 8], strides = [1, 1, 1]} : vector<1x8x32xf32> to vector<1x8x8xf32>
    %16 = arith.truncf %15 : vector<1x8x8xf32> to vector<1x8x8xbf16>
    %17 = vector.extract_strided_slice %12 {offsets = [0, 0, 0], sizes = [1, 8, 8], strides = [1, 1, 1]} : vector<1x8x32xf32> to vector<1x8x8xf32>
    %18 = arith.truncf %17 : vector<1x8x8xf32> to vector<1x8x8xbf16>
    %19 = vector.extract_strided_slice %14 {offsets = [0, 0, 0], sizes = [1, 8, 8], strides = [1, 1, 1]} : vector<1x8x32xf32> to vector<1x8x8xf32>
    %20 = arith.truncf %19 : vector<1x8x8xf32> to vector<1x8x8xbf16>
    "tpu.trace_start"() <{level = 10 : i32, message = "bqd,bkd->bqk"}> : () -> ()
    %cst_5 = arith.constant dense<0.000000e+00> : vector<1x8x8xf32>
    %21 = tpu.matmul %16, %18, %cst_5 {dimension_numbers = #tpu.dot_dimension_numbers<[2], [2], [1], [1], [0, 0, 0, 1, 1, 1], [0], [0]>} : vector<1x8x8xbf16>, vector<1x8x8xbf16>, vector<1x8x8xf32> -> vector<1x8x8xf32>
    "tpu.trace_stop"() : () -> ()
    %cst_6 = arith.constant dense<0xFF800000> : vector<1x8xf32>
    %22 = vector.multi_reduction <maximumf>, %21, %cst_6 [2] : vector<1x8x8xf32> to vector<1x8xf32>
    %23 = vector.shape_cast %22 : vector<1x8xf32> to vector<1x8x1xf32>
    %24 = vector.broadcast %23 : vector<1x8x1xf32> to vector<1x8x8xf32>
    %25 = arith.subf %21, %24 : vector<1x8x8xf32>
    %26 = math.exp %25 : vector<1x8x8xf32>
    %cst_7 = arith.constant dense<0.000000e+00> : vector<1x8xf32>
    %27 = vector.multi_reduction <add>, %26, %cst_7 [2] : vector<1x8x8xf32> to vector<1x8xf32>
    %28 = vector.shape_cast %27 : vector<1x8xf32> to vector<1x8x1xf32>
    %29 = tpu.reciprocal %28 {approx = true} : vector<1x8x1xf32> -> vector<1x8x1xf32>
    %30 = vector.broadcast %29 : vector<1x8x1xf32> to vector<1x8x8xf32>
    %31 = arith.mulf %26, %30 : vector<1x8x8xf32>
    %32 = arith.truncf %31 : vector<1x8x8xf32> to vector<1x8x8xbf16>
    "tpu.trace_start"() <{level = 10 : i32, message = "bqk,bkd->bqd"}> : () -> ()
    %cst_8 = arith.constant dense<0.000000e+00> : vector<1x8x8xf32>
    %33 = tpu.matmul %32, %20, %cst_8 {dimension_numbers = #tpu.dot_dimension_numbers<[2], [1], [1], [2], [0, 0, 0, 1, 1, 2], [0], [0]>} : vector<1x8x8xbf16>, vector<1x8x8xbf16>, vector<1x8x8xf32> -> vector<1x8x8xf32>
    "tpu.trace_stop"() : () -> ()
    %34 = vector.extract_strided_slice %10 {offsets = [0, 0, 8], sizes = [1, 8, 8], strides = [1, 1, 1]} : vector<1x8x32xf32> to vector<1x8x8xf32>
    %35 = arith.truncf %34 : vector<1x8x8xf32> to vector<1x8x8xbf16>
    %36 = vector.extract_strided_slice %12 {offsets = [0, 0, 8], sizes = [1, 8, 8], strides = [1, 1, 1]} : vector<1x8x32xf32> to vector<1x8x8xf32>
    %37 = arith.truncf %36 : vector<1x8x8xf32> to vector<1x8x8xbf16>
    %38 = vector.extract_strided_slice %14 {offsets = [0, 0, 8], sizes = [1, 8, 8], strides = [1, 1, 1]} : vector<1x8x32xf32> to vector<1x8x8xf32>
    %39 = arith.truncf %38 : vector<1x8x8xf32> to vector<1x8x8xbf16>
    "tpu.trace_start"() <{level = 10 : i32, message = "bqd,bkd->bqk"}> : () -> ()
    %cst_9 = arith.constant dense<0.000000e+00> : vector<1x8x8xf32>
    %40 = tpu.matmul %35, %37, %cst_9 {dimension_numbers = #tpu.dot_dimension_numbers<[2], [2], [1], [1], [0, 0, 0, 1, 1, 1], [0], [0]>} : vector<1x8x8xbf16>, vector<1x8x8xbf16>, vector<1x8x8xf32> -> vector<1x8x8xf32>
    "tpu.trace_stop"() : () -> ()
    %cst_10 = arith.constant dense<0xFF800000> : vector<1x8xf32>
    %41 = vector.multi_reduction <maximumf>, %40, %cst_10 [2] : vector<1x8x8xf32> to vector<1x8xf32>
    %42 = vector.shape_cast %41 : vector<1x8xf32> to vector<1x8x1xf32>
    %43 = vector.broadcast %42 : vector<1x8x1xf32> to vector<1x8x8xf32>
    %44 = arith.subf %40, %43 : vector<1x8x8xf32>
    %45 = math.exp %44 : vector<1x8x8xf32>
    %cst_11 = arith.constant dense<0.000000e+00> : vector<1x8xf32>
    %46 = vector.multi_reduction <add>, %45, %cst_11 [2] : vector<1x8x8xf32> to vector<1x8xf32>
    %47 = vector.shape_cast %46 : vector<1x8xf32> to vector<1x8x1xf32>
    %48 = tpu.reciprocal %47 {approx = true} : vector<1x8x1xf32> -> vector<1x8x1xf32>
    %49 = vector.broadcast %48 : vector<1x8x1xf32> to vector<1x8x8xf32>
    %50 = arith.mulf %45, %49 : vector<1x8x8xf32>
    %51 = arith.truncf %50 : vector<1x8x8xf32> to vector<1x8x8xbf16>
    "tpu.trace_start"() <{level = 10 : i32, message = "bqk,bkd->bqd"}> : () -> ()
    %cst_12 = arith.constant dense<0.000000e+00> : vector<1x8x8xf32>
    %52 = tpu.matmul %51, %39, %cst_12 {dimension_numbers = #tpu.dot_dimension_numbers<[2], [1], [1], [2], [0, 0, 0, 1, 1, 2], [0], [0]>} : vector<1x8x8xbf16>, vector<1x8x8xbf16>, vector<1x8x8xf32> -> vector<1x8x8xf32>
    "tpu.trace_stop"() : () -> ()
    %53 = vector.extract_strided_slice %10 {offsets = [0, 0, 16], sizes = [1, 8, 8], strides = [1, 1, 1]} : vector<1x8x32xf32> to vector<1x8x8xf32>
    %54 = arith.truncf %53 : vector<1x8x8xf32> to vector<1x8x8xbf16>
    %55 = vector.extract_strided_slice %12 {offsets = [0, 0, 16], sizes = [1, 8, 8], strides = [1, 1, 1]} : vector<1x8x32xf32> to vector<1x8x8xf32>
    %56 = arith.truncf %55 : vector<1x8x8xf32> to vector<1x8x8xbf16>
    %57 = vector.extract_strided_slice %14 {offsets = [0, 0, 16], sizes = [1, 8, 8], strides = [1, 1, 1]} : vector<1x8x32xf32> to vector<1x8x8xf32>
    %58 = arith.truncf %57 : vector<1x8x8xf32> to vector<1x8x8xbf16>
    "tpu.trace_start"() <{level = 10 : i32, message = "bqd,bkd->bqk"}> : () -> ()
    %cst_13 = arith.constant dense<0.000000e+00> : vector<1x8x8xf32>
    %59 = tpu.matmul %54, %56, %cst_13 {dimension_numbers = #tpu.dot_dimension_numbers<[2], [2], [1], [1], [0, 0, 0, 1, 1, 1], [0], [0]>} : vector<1x8x8xbf16>, vector<1x8x8xbf16>, vector<1x8x8xf32> -> vector<1x8x8xf32>
    "tpu.trace_stop"() : () -> ()
    %cst_14 = arith.constant dense<0xFF800000> : vector<1x8xf32>
    %60 = vector.multi_reduction <maximumf>, %59, %cst_14 [2] : vector<1x8x8xf32> to vector<1x8xf32>
    %61 = vector.shape_cast %60 : vector<1x8xf32> to vector<1x8x1xf32>
    %62 = vector.broadcast %61 : vector<1x8x1xf32> to vector<1x8x8xf32>
    %63 = arith.subf %59, %62 : vector<1x8x8xf32>
    %64 = math.exp %63 : vector<1x8x8xf32>
    %cst_15 = arith.constant dense<0.000000e+00> : vector<1x8xf32>
    %65 = vector.multi_reduction <add>, %64, %cst_15 [2] : vector<1x8x8xf32> to vector<1x8xf32>
    %66 = vector.shape_cast %65 : vector<1x8xf32> to vector<1x8x1xf32>
    %67 = tpu.reciprocal %66 {approx = true} : vector<1x8x1xf32> -> vector<1x8x1xf32>
    %68 = vector.broadcast %67 : vector<1x8x1xf32> to vector<1x8x8xf32>
    %69 = arith.mulf %64, %68 : vector<1x8x8xf32>
    %70 = arith.truncf %69 : vector<1x8x8xf32> to vector<1x8x8xbf16>
    "tpu.trace_start"() <{level = 10 : i32, message = "bqk,bkd->bqd"}> : () -> ()
    %cst_16 = arith.constant dense<0.000000e+00> : vector<1x8x8xf32>
    %71 = tpu.matmul %70, %58, %cst_16 {dimension_numbers = #tpu.dot_dimension_numbers<[2], [1], [1], [2], [0, 0, 0, 1, 1, 2], [0], [0]>} : vector<1x8x8xbf16>, vector<1x8x8xbf16>, vector<1x8x8xf32> -> vector<1x8x8xf32>
    "tpu.trace_stop"() : () -> ()
    %72 = vector.extract_strided_slice %10 {offsets = [0, 0, 24], sizes = [1, 8, 8], strides = [1, 1, 1]} : vector<1x8x32xf32> to vector<1x8x8xf32>
    %73 = arith.truncf %72 : vector<1x8x8xf32> to vector<1x8x8xbf16>
    %74 = vector.extract_strided_slice %12 {offsets = [0, 0, 24], sizes = [1, 8, 8], strides = [1, 1, 1]} : vector<1x8x32xf32> to vector<1x8x8xf32>
    %75 = arith.truncf %74 : vector<1x8x8xf32> to vector<1x8x8xbf16>
    %76 = vector.extract_strided_slice %14 {offsets = [0, 0, 24], sizes = [1, 8, 8], strides = [1, 1, 1]} : vector<1x8x32xf32> to vector<1x8x8xf32>
    %77 = arith.truncf %76 : vector<1x8x8xf32> to vector<1x8x8xbf16>
    "tpu.trace_start"() <{level = 10 : i32, message = "bqd,bkd->bqk"}> : () -> ()
    %cst_17 = arith.constant dense<0.000000e+00> : vector<1x8x8xf32>
    %78 = tpu.matmul %73, %75, %cst_17 {dimension_numbers = #tpu.dot_dimension_numbers<[2], [2], [1], [1], [0, 0, 0, 1, 1, 1], [0], [0]>} : vector<1x8x8xbf16>, vector<1x8x8xbf16>, vector<1x8x8xf32> -> vector<1x8x8xf32>
    "tpu.trace_stop"() : () -> ()
    %cst_18 = arith.constant dense<0xFF800000> : vector<1x8xf32>
    %79 = vector.multi_reduction <maximumf>, %78, %cst_18 [2] : vector<1x8x8xf32> to vector<1x8xf32>
    %80 = vector.shape_cast %79 : vector<1x8xf32> to vector<1x8x1xf32>
    %81 = vector.broadcast %80 : vector<1x8x1xf32> to vector<1x8x8xf32>
    %82 = arith.subf %78, %81 : vector<1x8x8xf32>
    %83 = math.exp %82 : vector<1x8x8xf32>
    %cst_19 = arith.constant dense<0.000000e+00> : vector<1x8xf32>
    %84 = vector.multi_reduction <add>, %83, %cst_19 [2] : vector<1x8x8xf32> to vector<1x8xf32>
    %85 = vector.shape_cast %84 : vector<1x8xf32> to vector<1x8x1xf32>
    %86 = tpu.reciprocal %85 {approx = true} : vector<1x8x1xf32> -> vector<1x8x1xf32>
    %87 = vector.broadcast %86 : vector<1x8x1xf32> to vector<1x8x8xf32>
    %88 = arith.mulf %83, %87 : vector<1x8x8xf32>
    %89 = arith.truncf %88 : vector<1x8x8xf32> to vector<1x8x8xbf16>
    "tpu.trace_start"() <{level = 10 : i32, message = "bqk,bkd->bqd"}> : () -> ()
    %cst_20 = arith.constant dense<0.000000e+00> : vector<1x8x8xf32>
    %90 = tpu.matmul %89, %77, %cst_20 {dimension_numbers = #tpu.dot_dimension_numbers<[2], [1], [1], [2], [0, 0, 0, 1, 1, 2], [0], [0]>} : vector<1x8x8xbf16>, vector<1x8x8xbf16>, vector<1x8x8xf32> -> vector<1x8x8xf32>
    "tpu.trace_stop"() : () -> ()
    %91 = tpu.concatenate %33, %52, %71, %90 in 2 : vector<1x8x8xf32>, vector<1x8x8xf32>, vector<1x8x8xf32>, vector<1x8x8xf32> -> vector<1x8x32xf32>
    %92 = vector.shape_cast %91 : vector<1x8x32xf32> to vector<8x32xf32>
    %93 = arith.truncf %92 : vector<8x32xf32> to vector<8x32xbf16>
    %c0_21 = arith.constant 0 : index
    %c0_22 = arith.constant 0 : index
    %94 = vector.load %arg4[%c0_21, %c0_22] : memref<32x32xbf16, #tpu.memory_space<vmem>>, vector<32x32xbf16>
    %cst_23 = arith.constant dense<0.000000e+00> : vector<8x32xf32>
    %95 = tpu.matmul %93, %94, %cst_23 {dimension_numbers = #tpu.dot_dimension_numbers<[1], [0], [0], [1], [0, 0, 1, 1], [], []>} : vector<8x32xbf16>, vector<32x32xbf16>, vector<8x32xf32> -> vector<8x32xf32>
    %c0_24 = arith.constant 0 : index
    %c0_25 = arith.constant 0 : index
    %96 = vector.load %arg5[%c0_24, %c0_25] : memref<1x32xf32, #tpu.memory_space<vmem>>, vector<1x32xf32>
    %97 = vector.shape_cast %96 : vector<1x32xf32> to vector<32xf32>
    %98 = vector.shape_cast %97 : vector<32xf32> to vector<1x32xf32>
    %99 = vector.broadcast %98 : vector<1x32xf32> to vector<8x32xf32>
    %100 = arith.addf %95, %99 : vector<8x32xf32>
    %101 = arith.addf %0, %100 : vector<8x32xf32>
    %102 = arith.truncf %101 : vector<8x32xf32> to vector<8x32xbf16>
    %c0_26 = arith.constant 0 : index
    %c0_27 = arith.constant 0 : index
    %103 = vector.load %arg6[%c0_26, %c0_27] : memref<32x32xbf16, #tpu.memory_space<vmem>>, vector<32x32xbf16>
    %cst_28 = arith.constant dense<0.000000e+00> : vector<8x32xf32>
    %104 = tpu.matmul %102, %103, %cst_28 {dimension_numbers = #tpu.dot_dimension_numbers<[1], [0], [0], [1], [0, 0, 1, 1], [], []>} : vector<8x32xbf16>, vector<32x32xbf16>, vector<8x32xf32> -> vector<8x32xf32>
    %c0_29 = arith.constant 0 : index
    %c0_30 = arith.constant 0 : index
    %105 = vector.load %arg7[%c0_29, %c0_30] : memref<1x32xf32, #tpu.memory_space<vmem>>, vector<1x32xf32>
    %106 = vector.shape_cast %105 : vector<1x32xf32> to vector<32xf32>
    %107 = vector.shape_cast %106 : vector<32xf32> to vector<1x32xf32>
    %108 = vector.broadcast %107 : vector<1x32xf32> to vector<8x32xf32>
    %109 = arith.addf %104, %108 : vector<8x32xf32>
    %110 = arith.addf %101, %109 : vector<8x32xf32>
    %c0_31 = arith.constant 0 : index
    %c0_32 = arith.constant 0 : index
    %111 = vector.load %arg8[%c0_31, %c0_32] : memref<8x32xf32, #tpu.memory_space<vmem>>, vector<8x32xf32>
    tpu.vector_store %arg8[%c0_31, %c0_32], %110 {strides = array<i32>} : memref<8x32xf32, #tpu.memory_space<vmem>>, vector<8x32xf32>,
    return
  }
  func.func @transform_0(%arg0: i32) -> (i32, i32) {
    %c0_i32 = arith.constant 0 : i32
    %c0_i32_0 = arith.constant 0 : i32
    return %arg0, %c0_i32 : i32, i32
  }
  func.func @transform_1(%arg0: i32) -> (i32, i32) {
    %c0_i32 = arith.constant 0 : i32
    %c0_i32_0 = arith.constant 0 : i32
    %c0_i32_1 = arith.constant 0 : i32
    return %c0_i32, %c0_i32_0 : i32, i32
  }
  func.func @transform_2(%arg0: i32) -> (i32, i32) {
    %c0_i32 = arith.constant 0 : i32
    %c0_i32_0 = arith.constant 0 : i32
    %c0_i32_1 = arith.constant 0 : i32
    return %c0_i32, %c0_i32_0 : i32, i32
  }
  func.func @transform_3(%arg0: i32) -> (i32, i32) {
    %c0_i32 = arith.constant 0 : i32
    %c0_i32_0 = arith.constant 0 : i32
    %c0_i32_1 = arith.constant 0 : i32
    return %c0_i32, %c0_i32_0 : i32, i32
  }
  func.func @transform_4(%arg0: i32) -> (i32, i32) {
    %c0_i32 = arith.constant 0 : i32
    %c0_i32_0 = arith.constant 0 : i32
    %c0_i32_1 = arith.constant 0 : i32
    return %c0_i32, %c0_i32_0 : i32, i32
  }
  func.func @transform_5(%arg0: i32) -> (i32, i32) {
    %c0_i32 = arith.constant 0 : i32
    %c0_i32_0 = arith.constant 0 : i32
    %c0_i32_1 = arith.constant 0 : i32
    return %c0_i32, %c0_i32_0 : i32, i32
  }
  func.func @transform_6(%arg0: i32) -> (i32, i32) {
    %c0_i32 = arith.constant 0 : i32
    %c0_i32_0 = arith.constant 0 : i32
    %c0_i32_1 = arith.constant 0 : i32
    return %c0_i32, %c0_i32_0 : i32, i32
  }
  func.func @transform_7(%arg0: i32) -> (i32, i32) {
    %c0_i32 = arith.constant 0 : i32
    %c0_i32_0 = arith.constant 0 : i32
    return %arg0, %c0_i32 : i32, i32
  }
}

</mosaic_0001>

<bundles_post_ra>
// kernel: tpu_custom_call.1
= control target key start
LH: loop header
LB: loop body
LE: loop exit
PB: predicated region body
PF: predicated region fallthrough
CT: control target
= control target key end

     0   :  { %s1465_s0 = inlined_call_operand.hbm [shape: f32[16,32], index: 0, kind: input, shape index: {}]   ;;  %s1466_s1 = inlined_call_operand.hbm [shape: bf16[32,96], index: 1, kind: input, shape index: {}]   ;;  %s1467_s2 = inlined_call_operand.vmem [shape: f32[1,96], index: 2, kind: input, shape index: {}]   ;;  %s1468_s3 = inlined_call_operand.hbm [shape: bf16[32,32], index: 3, kind: input, shape index: {}]   ;;  %s1469_s4 = inlined_call_operand.vmem [shape: f32[1,32], index: 4, kind: input, shape index: {}]   ;;  %s1470_s5 = inlined_call_operand.hbm [shape: bf16[32,32], index: 5, kind: input, shape index: {}]   ;;  %s1471_s6 = inlined_call_operand.vmem [shape: f32[1,32], index: 6, kind: input, shape index: {}]   ;;  %s1472_s7 = inlined_call_operand.hbm [shape: f32[16,32], index: 7, kind: output, shape index: {}]  }
   0x1   :  { %1473 = sst [smem:[#allocation15_spill]] %s1466_s1 }
   0x2   :  { %12 = vsyncpa [#allocation3], 0 }
   0x3   :  { %14 = vsyncpa [#allocation3 + $0x1], 0 }
   0x4   :  { %15 = vsyncpa [#allocation6], 0 }
   0x5   :  { %16 = vsyncpa [#allocation9], 0 }
   0x6   :  { %17 = vsyncpa [#allocation4], 0 }
   0x7   :  { %19 = vsyncpa [#allocation4 + $0x1], 0  ;;  %s1249_s24 = smov 0   ;;  %s1251_s25 = smov 0  }
   0x8   :  { %s1253_s26 = smov 0   ;;  %s1255_s27 = smov 0  }
   0x9 LB: > { %s1474_s1 = sld [smem:[#allocation15_spill]]  ;;  %s1273_s8 = sadd.s32 4294967295, %s1188_s27   ;;  %s1188_s27 = sphi %s1255_s27, %s1485_s27   ;;  %s1184_s26 = sphi %s1253_s26, %s1484_s26   ;;  %s1180_s25 = sphi %s1251_s25, %s1483_s25   ;;  %s1176_s24 = sphi %s1249_s24, %s1482_s24  }
   0xa   : > { %p824_p0 = scmp.ge.s32.totalorder %s1188_s27, 1  ;;  %p46_p1 = scmp.eq.s32.totalorder %s1273_s8, 0 }
   0xb   : > { %p208_p2 = scmp.lt.s32.totalorder %s1188_s27, 3  ;;  %s1190_s10 = smov [#allocation5]  }
   0xc   : > { %s221_s11 = sshll.u32 %s1190_s10, 4  ;;  %s236_s14 = sshll.u32 %s1468_s3, 4  ;;  %s222_s11 = int_to_ptr.vmem [resolvable:$true] %s221_s11  ;;  %s237_s14 = int_to_ptr.hbm [resolvable:$true] %s236_s14 }
   0xd   : > { %p1278_p3 = pnand %p824_p0, %p208_p2  ;;  %s253_s18 = sshll.u32 %s1470_s5, 4  ;;  %s254_s18 = int_to_ptr.hbm [resolvable:$true] %s253_s18 }
   0xe   : > { %s1191_s19 = smov [#allocation7]   ;;  %s1192_s21 = smov 64  }
   0xf   : > { %s219_s30 = sshll.u32 %s1474_s1, 4  ;;  %p898_p4 = pneg %p1278_p3  ;;  %s220_s30 = int_to_ptr.hbm [resolvable:$true] %s219_s30 }
  0x10   : > { %s238_s20 = sshll.u32 %s1191_s19, 4  ;;  %s1193_s22 = smov 4   ;;  %s239_s20 = int_to_ptr.vmem [resolvable:$true] %s238_s20 }
  0x11   : > { %p1290_p6 = pnand %p898_p4, %p46_p1  ;;  %s1194_s23 = smov [#allocation8]  }
  0x12   : > { %s255_s28 = sshll.u32 %s1194_s23, 4  ;;  %s823_s29 = sadd.s32 4294967294, %s1188_s27   ;;  %s256_s28 = int_to_ptr.vmem [resolvable:$true] %s255_s28 }
  0x13   : > { %901 = dma.hbm_to_vmem [thread:$0]  (!%p1290_p6), %s220_s30, 256, %s222_s11, [#allocation6], %s1192_s21, %s1192_s21, %s1193_s22  }
  0x14   : > { %904 = dma.hbm_to_vmem [thread:$0]  (!%p1290_p6), %s237_s14, 256, %s239_s20, [#allocation6], %s1192_s21, %s1192_s21, %s1193_s22  }
  0x15   : > { %907 = dma.hbm_to_vmem [thread:$0]  (!%p1290_p6), %s254_s18, 256, %s256_s28, [#allocation9], %s1192_s21, %s1192_s21, %s1193_s22  }
  0x16   : > { %s1305_s10 = sadd.s32 1, %s1188_s27   ;;  %s32_s12 = sadd.s32 1, %s1184_s26 }
  0x17   : > { %s29_s30 = ssub.s32 %s1188_s27, %s1305_s10  ;;  %p39_p7 = scmp.ne.s32.totalorder %s1184_s26, %s1180_s25 }
  0x18   : > { %p30_p8 = scmp.eq.s32.totalorder %s29_s30, 0  ;;  %p40_p9 = scmp.eq.s32.totalorder %s1188_s27, 0 }
  0x19   : > { %p45_p10 = scmp.ne.s32.totalorder %s1180_s25, %s1176_s24  ;;  %p195_p11 = scmp.eq.s32.totalorder %s1273_s8, 1 }
  0x1a   : > { %s1317_s11 = scalar_select %p30_p8, %s1184_s26, %s32_s12  }
  0x1b   : > { %p1321_p12 = por %p46_p1, %p45_p10  ;;  %p1325_p13 = por %p195_p11, %p39_p7 }
  0x1c   : > { %p201_p0 = scmp.eq.s32.totalorder %s823_s29, 1  ;;  %p41_p2 = por %p40_p9, %p39_p7 }
  0x1d   : > { %s272_s15 = sand.u32 1, %s1184_s26   ;;  %p919_p6 = scmp.lt.s32.totalorder %s1188_s27, 2 }
  0x1e   : > { %p1330_p4 = por %p201_p0, %p45_p10  ;;  %s829_s17 = sshll.u32 %s272_s15, 3 }
  0x1f   : > { %s830_s18 = sshll.u32 %s1188_s27, 3  ;;  %s276_s23 = scalar_lea.vmem [#allocation2], %s829_s17 }
  0x20   : > { %s280_s21 = scalar_lea.hbm %s1465_s0, %s830_s18  ;;  %s284_s28 = sshll.u32 %s276_s23, 4  ;;  %s285_s28 = int_to_ptr.vmem [resolvable:$true] %s284_s28 }
  0x21   : > { %s282_s22 = sshll.u32 %s280_s21, 4  ;;  %p1339_p8 = pnand %p919_p6, %p41_p2  ;;  %s283_s22 = int_to_ptr.hbm [resolvable:$true] %s282_s22 }
  0x22   : > { %s273_s12 = scalar_lea.sflag [#allocation3], %s272_s15  ;;  %s1084_s30 = sshra.s32 %s283_s22, 4  ;;  %s1085_s30 = int_to_ptr.hbm [resolvable:$true] %s1084_s30 }
  0x23   : > { %s1086_s1 = scalar_lea.hbm %s1085_s30, 8  ;;  %p1088_p9 = pneg %p1339_p8 }
  0x24   : > { %p1087_p7 = scmp.ne.s32.totalorder %s1085_s30, %s1086_s1  ;;  %s1091_s17 = scalar_lea.hbm %s1465_s0, 16 }
  0x25   : > { %p1092_p0 = scmp.lt.s32.totalorder %s1085_s30, %s1465_s0  ;;  %p1093_p2 = scmp.lt.s32.totalorder %s1091_s17, %s1086_s1 }
  0x26   : > { %p1089_p10 = pnand %p1088_p9, %p1087_p7 }
  0x27   : > { %p1094_p6 = por %p1093_p2, %p1092_p0 }
  0x28   : > { %p1090_p11 = pneg %p1089_p10 }
  0x2a   : > { %p1095_p5 = pnand %p1094_p6, %p1090_p11 }
  0x2c   : > { %1098 = shalt.err (!%p1095_p5)
}
  0x2d   : > { %911 = dma.hbm_to_vmem [thread:$0]  (!%p1339_p8), %s283_s22, 128, %s285_s28, %s273_s12  }
  0x2e   : > { %293 = sbr.rel (%p1278_p3) target bundleno = 1266 (0x4f2), region = 48  ;;  %s1356_s15 = sand.u32 (!%p1278_p3), 1, %s1180_s25  }
  0x2f   : > { %s832_s23 = sshll.u32 (!%p1278_p3), %s1356_s15, 3  ;;  %s296_s18 = scalar_lea.sflag (!%p1278_p3), [#allocation3], %s1356_s15 }
  0x30   : > { %s299_s1 = scalar_lea.vmem (!%p1278_p3), [#allocation2], %s832_s23 }
  0x33   : > { %1159 = dma.done.wait (%p1321_p12), %s296_s18, 128  }
  0x34   : > { %1161 = vsyncadd (%p1321_p12), %s296_s18, 4294967168 }
  0x35   : > { %1163 = dma.done.wait (%p46_p1), [#allocation6], 512  }
  0x36   : > { %1165 = vsyncadd (%p46_p1), [#allocation6], 4294966784 }
  0x37   : > { %1167 = dma.done.wait (%p46_p1), [#allocation9], 256  }
  0x38   : > { %1169 = vsyncadd (%p46_p1), [#allocation9], 4294967040  ;;  %v877_v0 = vld [vmem:[#allocation5 + $0x8] sm:$0xff]  ;;  %v876_v1 = vld [vmem:[#allocation5] sm:$0xff]  ;;  %vm369_vm0 = vcmask 261120   ;;  %s1195_s22 = smov 104  }
  0x39   : > { %379 = vmatpush.bf16.msra.mxu0 %v877_v0  ;;  %v1374_v2 = vld [vmem:[%s299_s1] sm:$0xff]  ;;  %s1196_s28 = smov 120   ;;  %s1197_s29 = smov 96   ;;  %vm392_vm1 = vcmask 64512   ;;  %vm429_vm2 = vcmask 1043456   ;;  %vm627_vm3 = vcmask 130048  }
  0x3a   : > { %v348_v3 = vpack.c.bf16 %v1374_v2, %v1374_v2  ;;  %v975_v4 = vld [vmem:[%s1467_s2] ss:$0 sm:$0xff]  ;;  %s1198_s12 = smov 80   ;;  %s1199_s30 = smov 72   ;;  %vm629_vm4 = vcmask 195584  }
  0x3b   : > { %s1200_s19 = smov 88   ;;  %s1201_s17 = smov 112  }
  0x3c   : > { %s1202_s20 = smov 64   ;;  %s1203_s21 = smov 40  }
  0x3d   : > { %380 = vmatpush.bf16.msra.mxu0 %v876_v1  ;;  %s1204_s18 = smov 56   ;;  %s1205_s1 = smov 48  }
  0x3e   : > { %s1206_s9 = smov 8   ;;  %s1207_s13 = smov 16  }
  0x40   : > { %845 = vmatmul.msk.bf16.vlgmr.msra.gmra.mxu0 %vm369_vm0, %v348_v3 }
  0xbd   : > { %v382_v5 = vpop.f32.mrf.mxu0 }
  0xbe   : > { %v383_v6 = vadd.f32 %v975_v4, %v382_v5 }
  0xc0   : > { %v386_v7 = vpack.c.bf16 %v383_v6, %v383_v6 }
  0xc2   : > { %v388_v8 = vunpack.c.l.b16 %v386_v7 }
  0xc4   : > { %v1382_v9 = vpack.c.b16 %v388_v8, %v388_v8 }
  0xc5   : > { %v384_v10 = vpop.f32.mrf.mxu0 }
  0xc6   : > { %558 = vrot.lane.b32.xlu2 %v1382_v9, %s1195_s22  ;;  %446 = vrot.lane.b32.xlu1 %v1382_v9, %s1196_s28  ;;  %s1208_s22 = smov 24  }
  0xc7   : > { %390 = vrot.lane.b32.xlu0 %v1382_v9, %s1197_s29 }
  0xce   : > { %504 = vrot.lane.b32.xlu2 %v1382_v9, %s1198_s12  ;;  %560 = vrot.lane.b32.xlu1 %v1382_v9, %s1199_s30  ;;  %s873_s12 = sshll.u32 %s1273_s8, 3  ;;  %s709_s8 = scalar_lea.sflag [#allocation4], %s1356_s15 }
  0xcf   : > { %448 = vrot.lane.b32.xlu0 %v1382_v9, %s1200_s19 }
  0xd7   : > { %502 = vrot.lane.b32.xlu0 %v1382_v9, %s1201_s17 }
 0x120   : > { %v559_v11 = vpop.permute.xlu2 %558 }
 0x128   : > { %v505_v12 = vpop.permute.xlu2 %504 }
 0x129   : > { %v510_v13 = vsel %vm392_vm1, %v505_v12, 0 }
 0x12a   : > { %519 = vmatpush.bf16.xpose.msrb.mxu0 %v510_v13 }
 0x138   : > { %v447_v14 = vpop.permute.xlu1 %446 }
 0x139   : > { %v391_v15 = vpop.permute.xlu0 %390 }
 0x13a   : > { %v397_v16 = vsel %vm392_vm1, %v391_v15, 0 }
 0x13b   : > { %406 = vmatpush.bf16.xpose.msra.mxu1 %v397_v16 }
 0x140   : > { %v561_v17 = vpop.permute.xlu1 %560 }
 0x141   : > { %v449_v18 = vpop.permute.xlu0 %448  ;;  %v566_v19 = vsel %vm392_vm1, %v561_v17, 0 }
 0x142   : > { %846 = vmatmul.msk.bf16.vlgmr.msra.gmra.mxu1 %vm392_vm1, %v386_v7  ;;  %v454_v20 = vsel %vm392_vm1, %v449_v18, 0 }
 0x143   : > { %463 = vmatpush.bf16.xpose.msra.mxu3 %v454_v20 }
 0x149   : > { %v503_v21 = vpop.permute.xlu0 %502 }
 0x14a   : > { %848 = vmatmul.msk.bf16.vlgmr.msra.gmra.mxu3 %vm392_vm1, %v447_v14  ;;  %850 = vmatmul.msk.bf16.vlgmr.msrb.gmra.mxu0 %vm392_vm1, %v503_v21 }
 0x14b   : > { %575 = vmatpush.bf16.xpose.msrb.mxu3 %v566_v19 }
 0x15a   : > { %852 = vmatmul.msk.bf16.vlgmr.msrb.gmra.mxu3 %vm392_vm1, %v559_v11 }
 0x1bf   : > { %v408_v22 = vpop.f32.mrf.mxu1 }
 0x1c0   : > { %v412_v23 = vsel %vm392_vm1, %v408_v22, -inf }
 0x1c1   : > { %413 = vmax.xlane.f32.xlu1 %v412_v23  ;;  %v879_v23 = vld [vmem:[#allocation7 + $0x8] sm:$0xff] }
 0x1c2   : > { %661 = vmatpush.bf16.msra.mxu0 %v879_v23 }
 0x1c7   : > { %v410_v24 = vpop.f32.mrf.mxu1  ;;  %v521_v25 = vpop.f32.mrf.mxu0 }
 0x1c8   : > { %v525_v30 = vsel %vm392_vm1, %v521_v25, -inf  ;;  %v878_v24 = vld [vmem:[#allocation7] sm:$0xff] }
 0x1c9   : > { %662 = vmatpush.bf16.msra.mxu0 %v878_v24 }
 0x1cd   : > { %v465_v26 = vpop.f32.mrf.mxu3 }
 0x1ce   : > { %v469_v27 = vsel %vm392_vm1, %v465_v26, -inf }
 0x1cf   : > { %470 = vmax.xlane.f32.xlu2 %v469_v27  ;;  %v523_v28 = vpop.f32.mrf.mxu0 }
 0x1d5   : > { %v467_v29 = vpop.f32.mrf.mxu3 }
 0x1d7   : > { %526 = vmax.xlane.f32.xlu2 %v525_v30 }
 0x1dd   : > { %v577_v31 = vpop.f32.mrf.mxu3 }
 0x1de   : > { %v581_v32 = vsel %vm392_vm1, %v577_v31, -inf }
 0x1df   : > { %582 = vmax.xlane.f32.xlu0 %v581_v32 }
 0x1e5   : > { %v579_v33 = vpop.f32.mrf.mxu3 }
 0x1ef   : > { %424 = vrot.lane.b32.xlu2 %v1382_v9, %s1202_s20 }
 0x1f7   : > { %593 = vrot.lane.b32.xlu2 %v1382_v9, %s1203_s21  ;;  %s719_s21 = scalar_lea.hbm %s1472_s7, %s873_s12 }
 0x234   : > { %v414_v34 = vpop.xlane.xlu1 %413 }
 0x235   : > { %v415_v35 = vsub.f32 %v408_v22, %v414_v34  ;;  %v976_v34 = vld [vmem:[%s1469_s4] ss:$0 sm:$0xff] }
 0x237   : > { %v416_v36 = vmul.f32 1.442695, %v415_v35 }
 0x239   : > { %978 = vpow2.f32 %v416_v36 }
 0x23f   : > { %v979_v37 = vpop.eup %978 }
 0x240   : > { %v418_v38 = vsel %vm392_vm1, %v979_v37, 0.0 }
 0x241   : > { %419 = vadd.xlane.f32.xlu1 %v418_v38 }
 0x242   : > { %v471_v39 = vpop.xlane.xlu2 %470 }
 0x243   : > { %v472_v42 = vsub.f32 %v465_v26, %v471_v39  ;;  %v880_v26 = vld [vmem:[#allocation8] sm:$0xff] }
 0x245   : > { %v473_v44 = vmul.f32 1.442695, %v472_v42 }
 0x24a   : > { %v527_v40 = vpop.xlane.xlu2 %526 }
 0x24b   : > { %v528_v41 = vsub.f32 %v521_v25, %v527_v40  ;;  %v881_v25 = vld [vmem:[#allocation8 + $0x8] sm:$0xff]  ;;  %v977_v40 = vld [vmem:[%s1471_s6] ss:$0 sm:$0xff] }
 0x24d   : > { %v529_v43 = vmul.f32 1.442695, %v528_v41 }
 0x24f   : > { %980 = vpow2.f32 %v529_v43 }
 0x250   : > { %982 = vpow2.f32 %v473_v44 }
 0x252   : > { %v425_v45 = vpop.permute.xlu2 %424  ;;  %v583_v46 = vpop.xlane.xlu0 %582 }
 0x253   : > { %v431_v47 = vsel %vm429_vm2, %v425_v45, 0  ;;  %v584_v49 = vsub.f32 %v577_v31, %v583_v46 }
 0x254   : > { %440 = vmatpush.bf16.msra.mxu2 %v431_v47 }
 0x255   : > { %v981_v48 = vpop.eup %980  ;;  %v585_v51 = vmul.f32 1.442695, %v584_v49 }
 0x256   : > { %v531_v50 = vsel %vm392_vm1, %v981_v48, 0.0  ;;  %v983_v52 = vpop.eup %982 }
 0x257   : > { %532 = vadd.xlane.f32.xlu0 %v531_v50  ;;  %984 = vpow2.f32 %v585_v51  ;;  %v475_v53 = vsel %vm392_vm1, %v983_v52, 0.0 }
 0x25a   : > { %481 = vrot.lane.b32.xlu1 %v1382_v9, %s1204_s18  ;;  %v594_v61 = vpop.permute.xlu2 %593  ;;  %s345_s18 = scalar_lea.vmem [#allocation10], %s832_s23  ;;  %s1134_s23 = scalar_lea.hbm %s1472_s7, 16 }
 0x25b   : > { %v599_v0 = vsel %vm429_vm2, %v594_v61, 0 }
 0x25d   : > { %v985_v54 = vpop.eup %984 }
 0x25e   : > { %v587_v55 = vsel %vm392_vm1, %v985_v54, 0.0 }
 0x25f   : > { %476 = vadd.xlane.f32.xlu0 %v475_v53 }
 0x267   : > { %588 = vadd.xlane.f32.xlu0 %v587_v55 }
 0x27b   : > { %537 = vrot.lane.b32.xlu0 %v1382_v9, %s1205_s1  ;;  %s721_s1 = sshll.u32 %s345_s18, 4  ;;  %s722_s1 = int_to_ptr.vmem [resolvable:$true] %s721_s1 }
 0x2b4   : > { %v420_v56 = vpop.xlane.xlu1 %419 }
 0x2b5   : > { %986 = vrcp.f32 %v420_v56 }
 0x2bb   : > { %v987_v57 = vpop.eup %986 }
 0x2bc   : > { %v422_v58 = vmul.f32 %v987_v57, %v979_v37 }
 0x2be   : > { %v423_v59 = vpack.c.bf16 %v422_v58, %v422_v58 }
 0x2c0   : > { %847 = vmatmul.msk.bf16.vlgmr.msra.gmra.mxu2 %vm392_vm1, %v423_v59 }
 0x2ca   : > { %v533_v60 = vpop.xlane.xlu0 %532 }
 0x2cc   : > { %v482_v62 = vpop.permute.xlu1 %481 }
 0x2cd   : > { %v487_v63 = vsel %vm429_vm2, %v482_v62, 0 }
 0x2ce   : > { %496 = vmatpush.bf16.msrb.mxu2 %v487_v63 }
 0x2d2   : > { %608 = vmatpush.bf16.msra.mxu2 %v599_v0  ;;  %v477_v1 = vpop.xlane.xlu0 %476 }
 0x2d3   : > { %988 = vrcp.f32 %v477_v1 }
 0x2d9   : > { %v989_v3 = vpop.eup %988 }
 0x2da   : > { %v479_v4 = vmul.f32 %v989_v3, %v983_v52  ;;  %v589_v5 = vpop.xlane.xlu0 %588 }
 0x2db   : > { %990 = vrcp.f32 %v589_v5 }
 0x2dc   : > { %v480_v6 = vpack.c.bf16 %v479_v4, %v479_v4  ;;  %992 = vrcp.f32 %v533_v60 }
 0x2de   : > { %849 = vmatmul.msk.bf16.vlgmr.msrb.gmra.mxu2 %vm392_vm1, %v480_v6 }
 0x2e1   : > { %v991_v7 = vpop.eup %990 }
 0x2e2   : > { %v591_v8 = vmul.f32 %v991_v7, %v985_v54  ;;  %v993_v9 = vpop.eup %992 }
 0x2e3   : > { %v535_v10 = vmul.f32 %v993_v9, %v981_v48 }
 0x2e4   : > { %v592_v11 = vpack.c.bf16 %v591_v8, %v591_v8 }
 0x2e5   : > { %v536_v14 = vpack.c.bf16 %v535_v10, %v535_v10 }
 0x2ed   : > { %v538_v12 = vpop.permute.xlu0 %537 }
 0x2ee   : > { %853 = vmatmul.msk.bf16.vlgmr.msra.gmra.mxu2 %vm392_vm1, %v592_v11  ;;  %v543_v13 = vsel %vm429_vm2, %v538_v12, 0 }
 0x2ef   : > { %552 = vmatpush.bf16.msrb.mxu1 %v543_v13 }
 0x2f2   : > { %851 = vmatmul.msk.bf16.vlgmr.msrb.gmra.mxu1 %vm392_vm1, %v536_v14 }
 0x2f3   : > { %699 = vmatpush.bf16.msra.mxu1 %v881_v25 }
 0x2f7   : > { %700 = vmatpush.bf16.msra.mxu1 %v880_v26 }
 0x343   : > { %v442_v15 = vpop.f32.mrf.mxu2 }
 0x34b   : > { %v444_v16 = vpop.f32.mrf.mxu2 }
 0x361   : > { %v498_v17 = vpop.f32.mrf.mxu2 }
 0x362   : > { %615 = vrot.lane.b32.xlu1 %v498_v17, %s1206_s9  ;;  %s723_s9 = sshll.u32 %s719_s21, 4  ;;  %s724_s9 = int_to_ptr.hbm [resolvable:$true] %s723_s9 }
 0x369   : > { %v500_v18 = vpop.f32.mrf.mxu2 }
 0x36f   : > { %v554_v19 = vpop.f32.mrf.mxu1 }
 0x370   : > { %619 = vrot.lane.b32.xlu2 %v554_v19, %s1207_s13  ;;  %s1128_s13 = sshra.s32 %s724_s9, 4  ;;  %s1129_s13 = int_to_ptr.hbm [resolvable:$true] %s1128_s13 }
 0x371   : > { %v610_v20 = vpop.f32.mrf.mxu2  ;;  %p1135_p12 = scmp.lt.s32.totalorder %s1129_s13, %s1472_s7 }
 0x372   : > { %623 = vrot.lane.b32.xlu1 %v610_v20, %s1208_s22  ;;  %s1130_s22 = scalar_lea.hbm %s1129_s13, 8 }
 0x373   : > { %p1131_p1 = scmp.ne.s32.totalorder %s1129_s13, %s1130_s22  ;;  %p1136_p8 = scmp.lt.s32.totalorder %s1134_s23, %s1130_s22 }
 0x375   : > { %p1132_p3 = pnand %p1131_p1, %p1325_p13  ;;  %p1137_p7 = por %p1136_p8, %p1135_p12 }
 0x377   : > { %v556_v21 = vpop.f32.mrf.mxu1  ;;  %p1133_p5 = pneg %p1132_p3 }
 0x379   : > { %v612_v22 = vpop.f32.mrf.mxu2  ;;  %p1138_p9 = pnand %p1137_p7, %p1133_p5 }
 0x3ca   : > { %v620_v29 = vpop.permute.xlu2 %619 }
 0x3d4   : > { %v616_v27 = vpop.permute.xlu1 %615 }
 0x3d5   : > { %v626_v28 = vsel %vm392_vm1, %v442_v15, %v616_v27 }
 0x3d6   : > { %v628_v31 = vsel %vm627_vm3, %v626_v28, %v620_v29 }
 0x3e4   : > { %v624_v30 = vpop.permute.xlu1 %623 }
 0x3e5   : > { %v630_v32 = vsel %vm629_vm4, %v628_v31, %v624_v30 }
 0x3e6   : > { %v631_v33 = vpack.c.bf16 %v630_v32, %v630_v32 }
 0x3e8   : > { %862 = vmatmul.msk.bf16.vlgmr.msra.gmra.mxu0 %vm369_vm0, %v631_v33 }
 0x465   : > { %v664_v35 = vpop.f32.mrf.mxu0 }
 0x466   : > { %v665_v36 = vadd.f32 %v976_v34, %v664_v35 }
 0x468   : > { %v668_v37 = vadd.f32 %v665_v36, %v1374_v2 }
 0x46a   : > { %v669_v38 = vpack.c.bf16 %v668_v37, %v668_v37 }
 0x46c   : > { %871 = vmatmul.msk.bf16.vlgmr.msra.gmra.mxu1 %vm369_vm0, %v669_v38 }
 0x46d   : > { %v666_v39 = vpop.f32.mrf.mxu0 }
 0x4e9   : > { %v702_v41 = vpop.f32.mrf.mxu1 }
 0x4ea   : > { %v703_v2 = vadd.f32 %v977_v40, %v702_v41 }
 0x4ec   : > { %v706_v42 = vadd.f32 %v703_v2, %v668_v37 }
 0x4ee   : > { %707 = vst.msk [vmem:[%s345_s18] sm:$0xff] %vm369_vm0, %v706_v42 }
 0x4ef   : > { %1141 = shalt.err (!%p1138_p9)
}
 0x4f0   : > { %896 = dma.vmem_to_hbm [thread:$0]  (%p1325_p13), %s722_s1, 128, %s724_s9, %s709_s8  }
 0x4f1   : > { %v704_v43 = vpop.f32.mrf.mxu1 }
 0x4f2 PF: > { %s735_s15 = sand.u32 1, %s1176_s24   ;;  %p1481_p10 = scmp.ge.s32.totalorder %s1188_s27, 2 }
 0x4f3   : > { %s736_s19 = scalar_lea.sflag [#allocation4], %s735_s15 }
 0x4f4   : > { %p913_p11 = pnand %p1481_p10, %p1330_p4 }
 0x4f6   : > { %p914_p0 = pneg %p913_p11 }
 0x4f8   : > { %1171 = dma.done.wait (%p914_p0), %s736_s19, 128  }
 0x4f9   : > { %1173 = vsyncadd (%p914_p0), %s736_s19, 4294967168  ;;  %p22_p2 = scmp.ge.s32.totalorder %s1305_s10, 4   ;;  %s1482_s24 = smov %s1180_s25 }
 0x4fa   : > { %s1483_s25 = smov %s1184_s26  ;;  %s1484_s26 = smov %s1317_s11 }
 0x4fb   : > { %s1485_s27 = smov %s1305_s10  ;;  %24 = sbr.rel (!%p22_p2) target bundleno = 9 (0x9), region = 105 }
 0x500   :  { %742 = vsyncpa [#allocation3], 1 }
 0x501   :  { %744 = vsyncpa [#allocation3 + $0x1], 1 }
 0x502   :  { %745 = vsyncpa [#allocation6], 1 }
 0x503   :  { %746 = vsyncpa [#allocation9], 1 }
 0x504   :  { %747 = vsyncpa [#allocation4], 1 }
 0x505   :  { %749 = vsyncpa [#allocation4 + $0x1], 1 }

// kernel: tpu_custom_call.1
= control target key start
LH: loop header
LB: loop body
LE: loop exit
PB: predicated region body
PF: predicated region fallthrough
CT: control target
= control target key end

     0   :  { %s1465_s0 = inlined_call_operand.hbm [shape: f32[16,32], index: 0, kind: input, shape index: {}]   ;;  %s1466_s1 = inlined_call_operand.hbm [shape: bf16[32,96], index: 1, kind: input, shape index: {}]   ;;  %s1467_s2 = inlined_call_operand.vmem [shape: f32[1,96], index: 2, kind: input, shape index: {}]   ;;  %s1468_s3 = inlined_call_operand.hbm [shape: bf16[32,32], index: 3, kind: input, shape index: {}]   ;;  %s1469_s4 = inlined_call_operand.vmem [shape: f32[1,32], index: 4, kind: input, shape index: {}]   ;;  %s1470_s5 = inlined_call_operand.hbm [shape: bf16[32,32], index: 5, kind: input, shape index: {}]   ;;  %s1471_s6 = inlined_call_operand.vmem [shape: f32[1,32], index: 6, kind: input, shape index: {}]   ;;  %s1472_s7 = inlined_call_operand.hbm [shape: f32[16,32], index: 7, kind: output, shape index: {}]  }
   0x1   :  { %1473 = sst [smem:[#allocation15_spill]] %s1466_s1 }
   0x2   :  { %12 = vsyncpa [#allocation3], 0 }
   0x3   :  { %14 = vsyncpa [#allocation3 + $0x1], 0 }
   0x4   :  { %15 = vsyncpa [#allocation6], 0 }
   0x5   :  { %16 = vsyncpa [#allocation9], 0 }
   0x6   :  { %17 = vsyncpa [#allocation4], 0 }
   0x7   :  { %19 = vsyncpa [#allocation4 + $0x1], 0  ;;  %s1249_s24 = smov 0   ;;  %s1251_s25 = smov 0  }
   0x8   :  { %s1253_s26 = smov 0   ;;  %s1255_s27 = smov 0  }
   0x9 LB: > { %s1474_s1 = sld [smem:[#allocation15_spill]]  ;;  %s1273_s8 = sadd.s32 4294967295, %s1188_s27   ;;  %s1188_s27 = sphi %s1255_s27, %s1485_s27   ;;  %s1184_s26 = sphi %s1253_s26, %s1484_s26   ;;  %s1180_s25 = sphi %s1251_s25, %s1483_s25   ;;  %s1176_s24 = sphi %s1249_s24, %s1482_s24  }
   0xa   : > { %p824_p0 = scmp.ge.s32.totalorder %s1188_s27, 1  ;;  %p46_p1 = scmp.eq.s32.totalorder %s1273_s8, 0 }
   0xb   : > { %p208_p2 = scmp.lt.s32.totalorder %s1188_s27, 3  ;;  %s1190_s10 = smov [#allocation5]  }
   0xc   : > { %s221_s11 = sshll.u32 %s1190_s10, 4  ;;  %s236_s14 = sshll.u32 %s1468_s3, 4  ;;  %s222_s11 = int_to_ptr.vmem [resolvable:$true] %s221_s11  ;;  %s237_s14 = int_to_ptr.hbm [resolvable:$true] %s236_s14 }
   0xd   : > { %p1278_p3 = pnand %p824_p0, %p208_p2  ;;  %s253_s18 = sshll.u32 %s1470_s5, 4  ;;  %s254_s18 = int_to_ptr.hbm [resolvable:$true] %s253_s18 }
   0xe   : > { %s1191_s19 = smov [#allocation7]   ;;  %s1192_s21 = smov 64  }
   0xf   : > { %s219_s30 = sshll.u32 %s1474_s1, 4  ;;  %p898_p4 = pneg %p1278_p3  ;;  %s220_s30 = int_to_ptr.hbm [resolvable:$true] %s219_s30 }
  0x10   : > { %s238_s20 = sshll.u32 %s1191_s19, 4  ;;  %s1193_s22 = smov 4   ;;  %s239_s20 = int_to_ptr.vmem [resolvable:$true] %s238_s20 }
  0x11   : > { %p1290_p6 = pnand %p898_p4, %p46_p1  ;;  %s1194_s23 = smov [#allocation8]  }
  0x12   : > { %s255_s28 = sshll.u32 %s1194_s23, 4  ;;  %s823_s29 = sadd.s32 4294967294, %s1188_s27   ;;  %s256_s28 = int_to_ptr.vmem [resolvable:$true] %s255_s28 }
  0x13   : > { %901 = dma.hbm_to_vmem [thread:$0]  (!%p1290_p6), %s220_s30, 256, %s222_s11, [#allocation6], %s1192_s21, %s1192_s21, %s1193_s22  }
  0x14   : > { %904 = dma.hbm_to_vmem [thread:$0]  (!%p1290_p6), %s237_s14, 256, %s239_s20, [#allocation6], %s1192_s21, %s1192_s21, %s1193_s22  }
  0x15   : > { %907 = dma.hbm_to_vmem [thread:$0]  (!%p1290_p6), %s254_s18, 256, %s256_s28, [#allocation9], %s1192_s21, %s1192_s21, %s1193_s22  }
  0x16   : > { %s1305_s10 = sadd.s32 1, %s1188_s27   ;;  %s32_s12 = sadd.s32 1, %s1184_s26 }
  0x17   : > { %s29_s30 = ssub.s32 %s1188_s27, %s1305_s10  ;;  %p39_p7 = scmp.ne.s32.totalorder %s1184_s26, %s1180_s25 }
  0x18   : > { %p30_p8 = scmp.eq.s32.totalorder %s29_s30, 0  ;;  %p40_p9 = scmp.eq.s32.totalorder %s1188_s27, 0 }
  0x19   : > { %p45_p10 = scmp.ne.s32.totalorder %s1180_s25, %s1176_s24  ;;  %p195_p11 = scmp.eq.s32.totalorder %s1273_s8, 1 }
  0x1a   : > { %s1317_s11 = scalar_select %p30_p8, %s1184_s26, %s32_s12  }
  0x1b   : > { %p1321_p12 = por %p46_p1, %p45_p10  ;;  %p1325_p13 = por %p195_p11, %p39_p7 }
  0x1c   : > { %p201_p0 = scmp.eq.s32.totalorder %s823_s29, 1  ;;  %p41_p2 = por %p40_p9, %p39_p7 }
  0x1d   : > { %s272_s15 = sand.u32 1, %s1184_s26   ;;  %p919_p6 = scmp.lt.s32.totalorder %s1188_s27, 2 }
  0x1e   : > { %p1330_p4 = por %p201_p0, %p45_p10  ;;  %s829_s17 = sshll.u32 %s272_s15, 3 }
  0x1f   : > { %s830_s18 = sshll.u32 %s1188_s27, 3  ;;  %s276_s23 = scalar_lea.vmem [#allocation2], %s829_s17 }
  0x20   : > { %s280_s21 = scalar_lea.hbm %s1465_s0, %s830_s18  ;;  %s284_s28 = sshll.u32 %s276_s23, 4  ;;  %s285_s28 = int_to_ptr.vmem [resolvable:$true] %s284_s28 }
  0x21   : > { %s282_s22 = sshll.u32 %s280_s21, 4  ;;  %p1339_p8 = pnand %p919_p6, %p41_p2  ;;  %s283_s22 = int_to_ptr.hbm [resolvable:$true] %s282_s22 }
  0x22   : > { %s273_s12 = scalar_lea.sflag [#allocation3], %s272_s15  ;;  %s1084_s30 = sshra.s32 %s283_s22, 4  ;;  %s1085_s30 = int_to_ptr.hbm [resolvable:$true] %s1084_s30 }
  0x23   : > { %s1086_s1 = scalar_lea.hbm %s1085_s30, 8  ;;  %p1088_p9 = pneg %p1339_p8 }
  0x24   : > { %p1087_p7 = scmp.ne.s32.totalorder %s1085_s30, %s1086_s1  ;;  %s1091_s17 = scalar_lea.hbm %s1465_s0, 16 }
  0x25   : > { %p1092_p0 = scmp.lt.s32.totalorder %s1085_s30, %s1465_s0  ;;  %p1093_p2 = scmp.lt.s32.totalorder %s1091_s17, %s1086_s1 }
  0x26   : > { %p1089_p10 = pnand %p1088_p9, %p1087_p7 }
  0x27   : > { %p1094_p6 = por %p1093_p2, %p1092_p0 }
  0x28   : > { %p1090_p11 = pneg %p1089_p10 }
  0x2a   : > { %p1095_p5 = pnand %p1094_p6, %p1090_p11 }
  0x2c   : > { %1098 = shalt.err (!%p1095_p5)
}
  0x2d   : > { %911 = dma.hbm_to_vmem [thread:$0]  (!%p1339_p8), %s283_s22, 128, %s285_s28, %s273_s12  }
  0x2e   : > { %293 = sbr.rel (%p1278_p3) target bundleno = 1266 (0x4f2), region = 48  ;;  %s1356_s15 = sand.u32 (!%p1278_p3), 1, %s1180_s25  }
  0x2f   : > { %s832_s23 = sshll.u32 (!%p1278_p3), %s1356_s15, 3  ;;  %s296_s18 = scalar_lea.sflag (!%p1278_p3), [#allocation3], %s1356_s15 }
  0x30   : > { %s299_s1 = scalar_lea.vmem (!%p1278_p3), [#allocation2], %s832_s23 }
  0x33   : > { %1159 = dma.done.wait (%p1321_p12), %s296_s18, 128  }
  0x34   : > { %1161 = vsyncadd (%p1321_p12), %s296_s18, 4294967168 }
  0x35   : > { %1163 = dma.done.wait (%p46_p1), [#allocation6], 512  }
  0x36   : > { %1165 = vsyncadd (%p46_p1), [#allocation6], 4294966784 }
  0x37   : > { %1167 = dma.done.wait (%p46_p1), [#allocation9], 256  }
  0x38   : > { %1169 = vsyncadd (%p46_p1), [#allocation9], 4294967040  ;;  %v877_v0 = vld [vmem:[#allocation5 + $0x8] sm:$0xff]  ;;  %v876_v1 = vld [vmem:[#allocation5] sm:$0xff]  ;;  %vm369_vm0 = vcmask 261120   ;;  %s1195_s22 = smov 104  }
  0x39   : > { %379 = vmatpush.bf16.msra.mxu0 %v877_v0  ;;  %v1374_v2 = vld [vmem:[%s299_s1] sm:$0xff]  ;;  %s1196_s28 = smov 120   ;;  %s1197_s29 = smov 96   ;;  %vm392_vm1 = vcmask 64512   ;;  %vm429_vm2 = vcmask 1043456   ;;  %vm627_vm3 = vcmask 130048  }
  0x3a   : > { %v348_v3 = vpack.c.bf16 %v1374_v2, %v1374_v2  ;;  %v975_v4 = vld [vmem:[%s1467_s2] ss:$0 sm:$0xff]  ;;  %s1198_s12 = smov 80   ;;  %s1199_s30 = smov 72   ;;  %vm629_vm4 = vcmask 195584  }
  0x3b   : > { %s1200_s19 = smov 88   ;;  %s1201_s17 = smov 112  }
  0x3c   : > { %s1202_s20 = smov 64   ;;  %s1203_s21 = smov 40  }
  0x3d   : > { %380 = vmatpush.bf16.msra.mxu0 %v876_v1  ;;  %s1204_s18 = smov 56   ;;  %s1205_s1 = smov 48  }
  0x3e   : > { %s1206_s9 = smov 8   ;;  %s1207_s13 = smov 16  }
  0x40   : > { %845 = vmatmul.msk.bf16.vlgmr.msra.gmra.mxu0 %vm369_vm0, %v348_v3 }
  0xbd   : > { %v382_v5 = vpop.f32.mrf.mxu0 }
  0xbe   : > { %v383_v6 = vadd.f32 %v975_v4, %v382_v5 }
  0xc0   : > { %v386_v7 = vpack.c.bf16 %v383_v6, %v383_v6 }
  0xc2   : > { %v388_v8 = vunpack.c.l.b16 %v386_v7 }
  0xc4   : > { %v1382_v9 = vpack.c.b16 %v388_v8, %v388_v8 }
  0xc5   : > { %v384_v10 = vpop.f32.mrf.mxu0 }
  0xc6   : > { %558 = vrot.lane.b32.xlu2 %v1382_v9, %s1195_s22  ;;  %446 = vrot.lane.b32.xlu1 %v1382_v9, %s1196_s28  ;;  %s1208_s22 = smov 24  }
  0xc7   : > { %390 = vrot.lane.b32.xlu0 %v1382_v9, %s1197_s29 }
  0xce   : > { %504 = vrot.lane.b32.xlu2 %v1382_v9, %s1198_s12  ;;  %560 = vrot.lane.b32.xlu1 %v1382_v9, %s1199_s30  ;;  %s873_s12 = sshll.u32 %s1273_s8, 3  ;;  %s709_s8 = scalar_lea.sflag [#allocation4], %s1356_s15 }
  0xcf   : > { %448 = vrot.lane.b32.xlu0 %v1382_v9, %s1200_s19 }
  0xd7   : > { %502 = vrot.lane.b32.xlu0 %v1382_v9, %s1201_s17 }
 0x120   : > { %v559_v11 = vpop.permute.xlu2 %558 }
 0x128   : > { %v505_v12 = vpop.permute.xlu2 %504 }
 0x129   : > { %v510_v13 = vsel %vm392_vm1, %v505_v12, 0 }
 0x12a   : > { %519 = vmatpush.bf16.xpose.msrb.mxu0 %v510_v13 }
 0x138   : > { %v447_v14 = vpop.permute.xlu1 %446 }
 0x139   : > { %v391_v15 = vpop.permute.xlu0 %390 }
 0x13a   : > { %v397_v16 = vsel %vm392_vm1, %v391_v15, 0 }
 0x13b   : > { %406 = vmatpush.bf16.xpose.msra.mxu1 %v397_v16 }
 0x140   : > { %v561_v17 = vpop.permute.xlu1 %560 }
 0x141   : > { %v449_v18 = vpop.permute.xlu0 %448  ;;  %v566_v19 = vsel %vm392_vm1, %v561_v17, 0 }
 0x142   : > { %846 = vmatmul.msk.bf16.vlgmr.msra.gmra.mxu1 %vm392_vm1, %v386_v7  ;;  %v454_v20 = vsel %vm392_vm1, %v449_v18, 0 }
 0x143   : > { %463 = vmatpush.bf16.xpose.msra.mxu3 %v454_v20 }
 0x149   : > { %v503_v21 = vpop.permute.xlu0 %502 }
 0x14a   : > { %848 = vmatmul.msk.bf16.vlgmr.msra.gmra.mxu3 %vm392_vm1, %v447_v14  ;;  %850 = vmatmul.msk.bf16.vlgmr.msrb.gmra.mxu0 %vm392_vm1, %v503_v21 }
 0x14b   : > { %575 = vmatpush.bf16.xpose.msrb.mxu3 %v566_v19 }
 0x15a   : > { %852 = vmatmul.msk.bf16.vlgmr.msrb.gmra.mxu3 %vm392_vm1, %v559_v11 }
 0x1bf   : > { %v408_v22 = vpop.f32.mrf.mxu1 }
 0x1c0   : > { %v412_v23 = vsel %vm392_vm1, %v408_v22, -inf }
 0x1c1   : > { %413 = vmax.xlane.f32.xlu1 %v412_v23  ;;  %v879_v23 = vld [vmem:[#allocation7 + $0x8] sm:$0xff] }
 0x1c2   : > { %661 = vmatpush.bf16.msra.mxu0 %v879_v23 }
 0x1c7   : > { %v410_v24 = vpop.f32.mrf.mxu1  ;;  %v521_v25 = vpop.f32.mrf.mxu0 }
 0x1c8   : > { %v525_v30 = vsel %vm392_vm1, %v521_v25, -inf  ;;  %v878_v24 = vld [vmem:[#allocation7] sm:$0xff] }
 0x1c9   : > { %662 = vmatpush.bf16.msra.mxu0 %v878_v24 }
 0x1cd   : > { %v465_v26 = vpop.f32.mrf.mxu3 }
 0x1ce   : > { %v469_v27 = vsel %vm392_vm1, %v465_v26, -inf }
 0x1cf   : > { %470 = vmax.xlane.f32.xlu2 %v469_v27  ;;  %v523_v28 = vpop.f32.mrf.mxu0 }
 0x1d5   : > { %v467_v29 = vpop.f32.mrf.mxu3 }
 0x1d7   : > { %526 = vmax.xlane.f32.xlu2 %v525_v30 }
 0x1dd   : > { %v577_v31 = vpop.f32.mrf.mxu3 }
 0x1de   : > { %v581_v32 = vsel %vm392_vm1, %v577_v31, -inf }
 0x1df   : > { %582 = vmax.xlane.f32.xlu0 %v581_v32 }
 0x1e5   : > { %v579_v33 = vpop.f32.mrf.mxu3 }
 0x1ef   : > { %424 = vrot.lane.b32.xlu2 %v1382_v9, %s1202_s20 }
 0x1f7   : > { %593 = vrot.lane.b32.xlu2 %v1382_v9, %s1203_s21  ;;  %s719_s21 = scalar_lea.hbm %s1472_s7, %s873_s12 }
 0x234   : > { %v414_v34 = vpop.xlane.xlu1 %413 }
 0x235   : > { %v415_v35 = vsub.f32 %v408_v22, %v414_v34  ;;  %v976_v34 = vld [vmem:[%s1469_s4] ss:$0 sm:$0xff] }
 0x237   : > { %v416_v36 = vmul.f32 1.442695, %v415_v35 }
 0x239   : > { %978 = vpow2.f32 %v416_v36 }
 0x23f   : > { %v979_v37 = vpop.eup %978 }
 0x240   : > { %v418_v38 = vsel %vm392_vm1, %v979_v37, 0.0 }
 0x241   : > { %419 = vadd.xlane.f32.xlu1 %v418_v38 }
 0x242   : > { %v471_v39 = vpop.xlane.xlu2 %470 }
 0x243   : > { %v472_v42 = vsub.f32 %v465_v26, %v471_v39  ;;  %v880_v26 = vld [vmem:[#allocation8] sm:$0xff] }
 0x245   : > { %v473_v44 = vmul.f32 1.442695, %v472_v42 }
 0x24a   : > { %v527_v40 = vpop.xlane.xlu2 %526 }
 0x24b   : > { %v528_v41 = vsub.f32 %v521_v25, %v527_v40  ;;  %v881_v25 = vld [vmem:[#allocation8 + $0x8] sm:$0xff]  ;;  %v977_v40 = vld [vmem:[%s1471_s6] ss:$0 sm:$0xff] }
 0x24d   : > { %v529_v43 = vmul.f32 1.442695, %v528_v41 }
 0x24f   : > { %980 = vpow2.f32 %v529_v43 }
 0x250   : > { %982 = vpow2.f32 %v473_v44 }
 0x252   : > { %v425_v45 = vpop.permute.xlu2 %424  ;;  %v583_v46 = vpop.xlane.xlu0 %582 }
 0x253   : > { %v431_v47 = vsel %vm429_vm2, %v425_v45, 0  ;;  %v584_v49 = vsub.f32 %v577_v31, %v583_v46 }
 0x254   : > { %440 = vmatpush.bf16.msra.mxu2 %v431_v47 }
 0x255   : > { %v981_v48 = vpop.eup %980  ;;  %v585_v51 = vmul.f32 1.442695, %v584_v49 }
 0x256   : > { %v531_v50 = vsel %vm392_vm1, %v981_v48, 0.0  ;;  %v983_v52 = vpop.eup %982 }
 0x257   : > { %532 = vadd.xlane.f32.xlu0 %v531_v50  ;;  %984 = vpow2.f32 %v585_v51  ;;  %v475_v53 = vsel %vm392_vm1, %v983_v52, 0.0 }
 0x25a   : > { %481 = vrot.lane.b32.xlu1 %v1382_v9, %s1204_s18  ;;  %v594_v61 = vpop.permute.xlu2 %593  ;;  %s345_s18 = scalar_lea.vmem [#allocation10], %s832_s23  ;;  %s1134_s23 = scalar_lea.hbm %s1472_s7, 16 }
 0x25b   : > { %v599_v0 = vsel %vm429_vm2, %v594_v61, 0 }
 0x25d   : > { %v985_v54 = vpop.eup %984 }
 0x25e   : > { %v587_v55 = vsel %vm392_vm1, %v985_v54, 0.0 }
 0x25f   : > { %476 = vadd.xlane.f32.xlu0 %v475_v53 }
 0x267   : > { %588 = vadd.xlane.f32.xlu0 %v587_v55 }
 0x27b   : > { %537 = vrot.lane.b32.xlu0 %v1382_v9, %s1205_s1  ;;  %s721_s1 = sshll.u32 %s345_s18, 4  ;;  %s722_s1 = int_to_ptr.vmem [resolvable:$true] %s721_s1 }
 0x2b4   : > { %v420_v56 = vpop.xlane.xlu1 %419 }
 0x2b5   : > { %986 = vrcp.f32 %v420_v56 }
 0x2bb   : > { %v987_v57 = vpop.eup %986 }
 0x2bc   : > { %v422_v58 = vmul.f32 %v987_v57, %v979_v37 }
 0x2be   : > { %v423_v59 = vpack.c.bf16 %v422_v58, %v422_v58 }
 0x2c0   : > { %847 = vmatmul.msk.bf16.vlgmr.msra.gmra.mxu2 %vm392_vm1, %v423_v59 }
 0x2ca   : > { %v533_v60 = vpop.xlane.xlu0 %532 }
 0x2cc   : > { %v482_v62 = vpop.permute.xlu1 %481 }
 0x2cd   : > { %v487_v63 = vsel %vm429_vm2, %v482_v62, 0 }
 0x2ce   : > { %496 = vmatpush.bf16.msrb.mxu2 %v487_v63 }
 0x2d2   : > { %608 = vmatpush.bf16.msra.mxu2 %v599_v0  ;;  %v477_v1 = vpop.xlane.xlu0 %476 }
 0x2d3   : > { %988 = vrcp.f32 %v477_v1 }
 0x2d9   : > { %v989_v3 = vpop.eup %988 }
 0x2da   : > { %v479_v4 = vmul.f32 %v989_v3, %v983_v52  ;;  %v589_v5 = vpop.xlane.xlu0 %588 }
 0x2db   : > { %990 = vrcp.f32 %v589_v5 }
 0x2dc   : > { %v480_v6 = vpack.c.bf16 %v479_v4, %v479_v4  ;;  %992 = vrcp.f32 %v533_v60 }
 0x2de   : > { %849 = vmatmul.msk.bf16.vlgmr.msrb.gmra.mxu2 %vm392_vm1, %v480_v6 }
 0x2e1   : > { %v991_v7 = vpop.eup %990 }
 0x2e2   : > { %v591_v8 = vmul.f32 %v991_v7, %v985_v54  ;;  %v993_v9 = vpop.eup %992 }
 0x2e3   : > { %v535_v10 = vmul.f32 %v993_v9, %v981_v48 }
 0x2e4   : > { %v592_v11 = vpack.c.bf16 %v591_v8, %v591_v8 }
 0x2e5   : > { %v536_v14 = vpack.c.bf16 %v535_v10, %v535_v10 }
 0x2ed   : > { %v538_v12 = vpop.permute.xlu0 %537 }
 0x2ee   : > { %853 = vmatmul.msk.bf16.vlgmr.msra.gmra.mxu2 %vm392_vm1, %v592_v11  ;;  %v543_v13 = vsel %vm429_vm2, %v538_v12, 0 }
 0x2ef   : > { %552 = vmatpush.bf16.msrb.mxu1 %v543_v13 }
 0x2f2   : > { %851 = vmatmul.msk.bf16.vlgmr.msrb.gmra.mxu1 %vm392_vm1, %v536_v14 }
 0x2f3   : > { %699 = vmatpush.bf16.msra.mxu1 %v881_v25 }
 0x2f7   : > { %700 = vmatpush.bf16.msra.mxu1 %v880_v26 }
 0x343   : > { %v442_v15 = vpop.f32.mrf.mxu2 }
 0x34b   : > { %v444_v16 = vpop.f32.mrf.mxu2 }
 0x361   : > { %v498_v17 = vpop.f32.mrf.mxu2 }
 0x362   : > { %615 = vrot.lane.b32.xlu1 %v498_v17, %s1206_s9  ;;  %s723_s9 = sshll.u32 %s719_s21, 4  ;;  %s724_s9 = int_to_ptr.hbm [resolvable:$true] %s723_s9 }
 0x369   : > { %v500_v18 = vpop.f32.mrf.mxu2 }
 0x36f   : > { %v554_v19 = vpop.f32.mrf.mxu1 }
 0x370   : > { %619 = vrot.lane.b32.xlu2 %v554_v19, %s1207_s13  ;;  %s1128_s13 = sshra.s32 %s724_s9, 4  ;;  %s1129_s13 = int_to_ptr.hbm [resolvable:$true] %s1128_s13 }
 0x371   : > { %v610_v20 = vpop.f32.mrf.mxu2  ;;  %p1135_p12 = scmp.lt.s32.totalorder %s1129_s13, %s1472_s7 }
 0x372   : > { %623 = vrot.lane.b32.xlu1 %v610_v20, %s1208_s22  ;;  %s1130_s22 = scalar_lea.hbm %s1129_s13, 8 }
 0x373   : > { %p1131_p1 = scmp.ne.s32.totalorder %s1129_s13, %s1130_s22  ;;  %p1136_p8 = scmp.lt.s32.totalorder %s1134_s23, %s1130_s22 }
 0x375   : > { %p1132_p3 = pnand %p1131_p1, %p1325_p13  ;;  %p1137_p7 = por %p1136_p8, %p1135_p12 }
 0x377   : > { %v556_v21 = vpop.f32.mrf.mxu1  ;;  %p1133_p5 = pneg %p1132_p3 }
 0x379   : > { %v612_v22 = vpop.f32.mrf.mxu2  ;;  %p1138_p9 = pnand %p1137_p7, %p1133_p5 }
 0x3ca   : > { %v620_v29 = vpop.permute.xlu2 %619 }
 0x3d4   : > { %v616_v27 = vpop.permute.xlu1 %615 }
 0x3d5   : > { %v626_v28 = vsel %vm392_vm1, %v442_v15, %v616_v27 }
 0x3d6   : > { %v628_v31 = vsel %vm627_vm3, %v626_v28, %v620_v29 }
 0x3e4   : > { %v624_v30 = vpop.permute.xlu1 %623 }
 0x3e5   : > { %v630_v32 = vsel %vm629_vm4, %v628_v31, %v624_v30 }
 0x3e6   : > { %v631_v33 = vpack.c.bf16 %v630_v32, %v630_v32 }
 0x3e8   : > { %862 = vmatmul.msk.bf16.vlgmr.msra.gmra.mxu0 %vm369_vm0, %v631_v33 }
 0x465   : > { %v664_v35 = vpop.f32.mrf.mxu0 }
 0x466   : > { %v665_v36 = vadd.f32 %v976_v34, %v664_v35 }
 0x468   : > { %v668_v37 = vadd.f32 %v665_v36, %v1374_v2 }
 0x46a   : > { %v669_v38 = vpack.c.bf16 %v668_v37, %v668_v37 }
 0x46c   : > { %871 = vmatmul.msk.bf16.vlgmr.msra.gmra.mxu1 %vm369_vm0, %v669_v38 }
 0x46d   : > { %v666_v39 = vpop.f32.mrf.mxu0 }
 0x4e9   : > { %v702_v41 = vpop.f32.mrf.mxu1 }
 0x4ea   : > { %v703_v2 = vadd.f32 %v977_v40, %v702_v41 }
 0x4ec   : > { %v706_v42 = vadd.f32 %v703_v2, %v668_v37 }
 0x4ee   : > { %707 = vst.msk [vmem:[%s345_s18] sm:$0xff] %vm369_vm0, %v706_v42 }
 0x4ef   : > { %1141 = shalt.err (!%p1138_p9)
}
 0x4f0   : > { %896 = dma.vmem_to_hbm [thread:$0]  (%p1325_p13), %s722_s1, 128, %s724_s9, %s709_s8  }
 0x4f1   : > { %v704_v43 = vpop.f32.mrf.mxu1 }
 0x4f2 PF: > { %s735_s15 = sand.u32 1, %s1176_s24   ;;  %p1481_p10 = scmp.ge.s32.totalorder %s1188_s27, 2 }
 0x4f3   : > { %s736_s19 = scalar_lea.sflag [#allocation4], %s735_s15 }
 0x4f4   : > { %p913_p11 = pnand %p1481_p10, %p1330_p4 }
 0x4f6   : > { %p914_p0 = pneg %p913_p11 }
 0x4f8   : > { %1171 = dma.done.wait (%p914_p0), %s736_s19, 128  }
 0x4f9   : > { %1173 = vsyncadd (%p914_p0), %s736_s19, 4294967168  ;;  %p22_p2 = scmp.ge.s32.totalorder %s1305_s10, 4   ;;  %s1482_s24 = smov %s1180_s25 }
 0x4fa   : > { %s1483_s25 = smov %s1184_s26  ;;  %s1484_s26 = smov %s1317_s11 }
 0x4fb   : > { %s1485_s27 = smov %s1305_s10  ;;  %24 = sbr.rel (!%p22_p2) target bundleno = 9 (0x9), region = 105 }
 0x500   :  { %742 = vsyncpa [#allocation3], 1 }
 0x501   :  { %744 = vsyncpa [#allocation3 + $0x1], 1 }
 0x502   :  { %745 = vsyncpa [#allocation6], 1 }
 0x503   :  { %746 = vsyncpa [#allocation9], 1 }
 0x504   :  { %747 = vsyncpa [#allocation4], 1 }
 0x505   :  { %749 = vsyncpa [#allocation4 + $0x1], 1 }

</bundles_post_ra>
